<compile_context>
chip_gen: v7x
topology: tpu7x:2x2x1
jax: 0.10.0
libtpu: 0.0.40
codegen_flags: <defaults>
</compile_context>

<pallas_src>
import functools
import math

import jax
import jax.numpy as jnp
from jax.experimental import pallas as pl
from jax.experimental.pallas import tpu as pltpu

_EPS = 1e-5                      # nn.BatchNorm2d default eps
_FEATURES_OUT = 64               # final nn.Linear(..., 64)
_LANE = 128
_MAX_DENSE_OP_BYTES = 8 * 1024 * 1024
_HIGHEST = jax.lax.Precision.HIGHEST


# ------------------------------ Pallas kernel -------------------------------

def _bn_relu_channel(y):
    """Training-mode BatchNorm2d (gamma=1, beta=0) + ReLU when each column is
    exactly one channel (hw == 1): plain VPU math over the batch axis."""
    mean = jnp.mean(y, axis=0, keepdims=True)
    d = y - mean
    var = jnp.mean(d * d, axis=0, keepdims=True)
    return jnp.maximum(d * jax.lax.rsqrt(var + _EPS), 0.0)


def _bn_relu_spatial(y, r, rt, hw):
    """Training-mode BatchNorm2d (gamma=1, beta=0) + ReLU.

    y:  (B, c*hw) f32, columns ordered (channel, h, w) so channel `ch` owns the
        contiguous column block [ch*hw, (ch+1)*hw).
    r:  (c*hw, c) f32 0/1 channel indicator (hoisted, prepared once).
    rt: (c, c*hw) f32 its transpose.

    Exact batch statistics over the whole VMEM-resident batch via
      * ONE stats matmul      [y ; y*y] @ r    (per-channel sum / sum-sq)
      * ONE broadcast matmul  [mean ; inv_std] @ rt
    """
    b = y.shape[0]
    inv_n = 1.0 / (b * hw)

    stacked = jnp.concatenate([y, y * y], axis=0)                     # (2B, f)
    s = jnp.dot(stacked, r, preferred_element_type=jnp.float32,
                precision=_HIGHEST)                                   # (2B, c)
    mean_c = jnp.sum(s[:b], axis=0, keepdims=True) * inv_n            # (1, c)
    ex2_c = jnp.sum(s[b:], axis=0, keepdims=True) * inv_n             # (1, c)
    var_c = jnp.maximum(ex2_c - mean_c * mean_c, 0.0)
    inv_std_c = jax.lax.rsqrt(var_c + _EPS)                           # (1, c)

    bc = jnp.dot(jnp.concatenate([mean_c, inv_std_c], axis=0), rt,
                 preferred_element_type=jnp.float32,
                 precision=_HIGHEST)                                  # (2, f)
    return jnp.maximum((y - bc[0:1]) * bc[1:2], 0.0)


def _encoder_kernel(*refs, meta):
    """Entire ImageEncoder forward in one kernel invocation.

    refs = (x, [T_l (+ r_l, rt_l if hw_l > 1)] per conv layer, W_lin, b_lin, out)
      x:     (B, Cin*H*W)       f32  per-sample NCHW flatten
      T_l:   (F_in_l, F_out_l)  bf16 dense conv operator (prepared once)
      r_l:   (F_out_l, Cout_l)  f32  0/1 channel indicator
      rt_l:  (Cout_l, F_out_l)  f32  its transpose
      W_lin: (F_last, 128)      bf16 lane-padded linear weight
      b_lin: (1, 128)           f32  lane-padded linear bias
      out:   (B, 128)           f32  lane-dense store; sliced to (B, 64) outside
    meta = (hw_1, ..., hw_L) static spatial size (Hout*Wout) per conv layer.

    Conv biases are omitted: training-mode BN mean subtraction cancels them.
    """
    x_ref, o_ref = refs[0], refs[-1]
    idx = 1
    h = x_ref[...].astype(jnp.bfloat16)
    for hw in meta:
        t = refs[idx][...]
        idx += 1
        # One MXU matmul per conv layer (contraction dim fully folded).
        y = jnp.dot(h, t, preferred_element_type=jnp.float32)
        if hw > 1:
            y = _bn_relu_spatial(y, refs[idx][...], refs[idx + 1][...], hw)
            idx += 2
        else:
            y = _bn_relu_channel(y)
        h = y.astype(jnp.bfloat16)

    w_lin = refs[idx][...]
    b_lin = refs[idx + 1][...]
    o_ref[...] = jnp.dot(h, w_lin, preferred_element_type=jnp.float32) + b_lin


# ------------------------- parameter prep (one-time) -------------------------

def build_layer_cfg(input_channels, output_size):
    """Mirror ImageEncoder._create_conf_layers channel/spatial bookkeeping."""
    n = int(math.log2(output_size))
    cfg, in_ch, out_ch, h = [], input_channels, 4, output_size
    for _ in range(n):
        cfg.append(dict(cin=in_ch, cout=out_ch, k=4, stride=2, pad=1,
                        hin=h, hout=h // 2))
        in_ch, out_ch, h = out_ch, out_ch * 2, h // 2
    out_ch //= 2  # == in_ch
    cfg.append(dict(cin=in_ch, cout=out_ch, k=3, stride=1, pad=1, hin=h, hout=h))
    return cfg


def _conv_to_dense(w, hin, stride, pad):
    """Materialize Conv2d(weight=w, stride, pad) on a (hin, hin) input as a dense
    per-sample operator T with flatten_NCHW(conv(x)) == flatten_NCHW(x) @ T.
    Entries of T are exact copies of w's entries (or 0), so bf16-casting T is
    bit-identical to bf16-casting the raw conv weight."""
    cout, cin, k, _ = w.shape
    hout = (hin + 2 * pad - k) // stride + 1
    t6 = jnp.zeros((cin, hin, hin, cout, hout, hout), jnp.float32)
    rows_in = jnp.arange(hin)
    for kh in range(k):
        hi = stride * jnp.arange(hout) - pad + kh
        eh = (rows_in[:, None] == hi[None, :]).astype(jnp.float32)    # (hin, hout)
        for kw in range(k):
            wi = stride * jnp.arange(hout) - pad + kw
            ew = (rows_in[:, None] == wi[None, :]).astype(jnp.float32)
            t6 = t6 + (w[:, :, kh, kw].T[:, None, None, :, None, None]
                       * eh[None, :, None, None, :, None]
                       * ew[None, None, :, None, None, :])
    return t6.reshape(cin * hin * hin, cout * hout * hout)


def _make_channel_indicators(c, hw):
    """0/1 indicator (f, c) mapping column j -> channel j // hw, and transpose."""
    f = c * hw
    ch_of_col = jnp.arange(f) // hw
    r = (ch_of_col[:, None] == jnp.arange(c)[None, :]).astype(jnp.float32)
    return r, r.T


def prepare_params(params, cfg, lane=_LANE):
    """Hoisted (one-time) weight preparation: dense bf16 conv operators, hoisted
    BN indicator matrices, lane-padded bf16 linear weight + f32 bias, and static
    per-layer spatial metadata.  Conv biases are intentionally dropped (exactly
    cancelled by the following training-mode BatchNorm)."""
    conv_ops, meta = [], []
    for (w, _b), c in zip(params[:-1], cfg):
        t = _conv_to_dense(w, c["hin"], c["stride"], c["pad"]).astype(jnp.bfloat16)
        assert t.size * 2 <= _MAX_DENSE_OP_BYTES, (
            f"dense conv operator {t.shape} exceeds {_MAX_DENSE_OP_BYTES} bytes; "
            "use an im2col-folded tiled kernel for this size")  # TODO(synk)
        hw = c["hout"] * c["hout"]
        if hw > 1:
            r, rt = _make_channel_indicators(c["cout"], hw)
            conv_ops.append((t, r, rt))
        else:
            conv_ops.append((t,))
        meta.append(hw)

    w_lin, b_lin = params[-1]
    out_f, feat_in = w_lin.shape
    n_pad = ((out_f + lane - 1) // lane) * lane     # lane-dense output store
    w_pad = jnp.zeros((feat_in, n_pad), jnp.float32).at[:, :out_f].set(w_lin.T)
    b_pad = jnp.zeros((1, n_pad), jnp.float32).at[:, :out_f].set(b_lin[None, :])
    return conv_ops, (w_pad.astype(jnp.bfloat16), b_pad), tuple(meta), out_f


def init_params(key, cfg, out_features=_FEATURES_OUT):
    """Deterministic synthetic parameters in PyTorch layouts:
    Conv2d weight (Cout, Cin, K, K), bias 0.01; Linear weight (out, in), bias 0.03.
    (Exact kaiming/orthogonal init values do not affect forward semantics.)"""
    params = []
    for c in cfg:
        key, kw = jax.random.split(key)
        fan_out = c["cout"] * c["k"] * c["k"]
        w = jax.random.normal(kw, (c["cout"], c["cin"], c["k"], c["k"]),
                              jnp.float32) * jnp.sqrt(2.0 / fan_out)
        b = jnp.full((c["cout"],), 0.01, jnp.float32)
        params.append((w, b))
    feat_in = cfg[-1]["cout"] * cfg[-1]["hout"] ** 2
    key, kw = jax.random.split(key)
    w_lin = jax.random.normal(kw, (out_features, feat_in),
                              jnp.float32) / jnp.sqrt(float(feat_in))
    b_lin = jnp.full((out_features,), 0.03, jnp.float32)
    params.append((w_lin, b_lin))
    return params


# --------------------------------- wrapper -----------------------------------

def make_image_encoder(prepared):
    """Returns a jitted forward: x (B,C,H,W) or (C,H,W) -> (B, 64).
    Single fused pallas_call; all activations stay VMEM-resident."""
    conv_ops, (w_lin_pad, b_lin_pad), meta, out_features = prepared
    flat_weights = []
    for op in conv_ops:
        flat_weights.extend(op)
    flat_weights += [w_lin_pad, b_lin_pad]
    n_args = 1 + len(flat_weights)
    kernel = functools.partial(_encoder_kernel, meta=meta)

    # TODO(synk): for large B, add grid=(B // bt,) over the batch axis with
    #   constant-block weight index_maps, dimension_semantics=("parallel",)
    #   (v7x dual-TC), and a two-pass global BN reduction.
    @jax.jit
    def forward(x):
        if x.ndim == 3:                 # mirrors the PyTorch unsqueeze(0)
            x = x[None]
        b = x.shape[0]
        xf = x.reshape(b, -1)           # per-sample NCHW flatten (nn.Flatten order)
        out_pad = pl.pallas_call(
            kernel,
            out_shape=jax.ShapeDtypeStruct((b, w_lin_pad.shape[1]), jnp.float32),
            in_specs=[pl.BlockSpec(memory_space=pltpu.MemorySpace.VMEM)] * n_args,
            out_specs=pl.BlockSpec(memory_space=pltpu.MemorySpace.VMEM),
            compiler_params=pltpu.CompilerParams(
                vmem_limit_bytes=32 * 1024 * 1024),
        )(xf, *flat_weights)
        return out_pad[:, :out_features]

    return forward


# ------------- independent XLA reference (same precision policy) -------------

def _reference_forward(x, params, cfg):
    """Pure-JAX reference via lax.conv_general_dilated (NCHW/OIHW), keeping the
    conv biases (the kernel drops them; BN cancellation makes this equivalent)
    and the same bf16-operand / f32-accumulation policy as the kernel."""
    if x.ndim == 3:
        x = x[None]
    h = x
    for (w, b), c in zip(params[:-1], cfg):
        y = jax.lax.conv_general_dilated(
            h.astype(jnp.bfloat16), w.astype(jnp.bfloat16),
            window_strides=(c["stride"], c["stride"]),
            padding=[(c["pad"], c["pad"])] * 2,
            dimension_numbers=("NCHW", "OIHW", "NCHW"),
            preferred_element_type=jnp.float32)
        y = y + b[None, :, None, None]
        mean = jnp.mean(y, axis=(0, 2, 3), keepdims=True)
        var = jnp.mean(jnp.square(y - mean), axis=(0, 2, 3), keepdims=True)
        h = jnp.maximum((y - mean) * jax.lax.rsqrt(var + _EPS), 0.0)
    w_lin, b_lin = params[-1]
    hf = h.reshape(h.shape[0], -1)
    return jnp.dot(hf.astype(jnp.bfloat16), w_lin.T.astype(jnp.bfloat16),
                   preferred_element_type=jnp.float32) + b_lin[None, :]


if __name__ == "__main__":
    key = jax.random.PRNGKey(0)
    kx, kp = jax.random.split(key)

    batch, input_channels, output_size = 2, 4, 16
    # The module's Flatten/Linear sizing implies square inputs of side `output_size`.
    x = jax.random.normal(
        kx, (batch, input_channels, output_size, output_size), jnp.float32)

    cfg = build_layer_cfg(input_channels, output_size)
    params = init_params(kp, cfg)
    prepared = prepare_params(params, cfg)      # hoisted weight/indicator prep
    forward = make_image_encoder(prepared)      # one jitted dispatch per call

    out = jax.block_until_ready(forward(x))
    assert out.shape == (batch, _FEATURES_OUT), out.shape
    assert bool(jnp.all(jnp.isfinite(out)))

    ref = jax.block_until_ready(_reference_forward(x, params, cfg))
    max_err = float(jnp.max(jnp.abs(out - ref)))
    assert max_err < 5e-2, f"mismatch vs reference: max abs err {max_err}"

    print("KERNEL_OK")
</pallas_src>

<mosaic_0001>
module attributes {stable_mosaic.version = 11 : i64} {
  func.func @_encoder_kernel(%arg0: memref<2x1024xf32, #tpu.memory_space<vmem>>, %arg1: memref<1024x256xbf16, #tpu.memory_space<vmem>>, %arg2: memref<256x4xf32, #tpu.memory_space<vmem>>, %arg3: memref<4x256xf32, #tpu.memory_space<vmem>>, %arg4: memref<256x128xbf16, #tpu.memory_space<vmem>>, %arg5: memref<128x8xf32, #tpu.memory_space<vmem>>, %arg6: memref<8x128xf32, #tpu.memory_space<vmem>>, %arg7: memref<128x64xbf16, #tpu.memory_space<vmem>>, %arg8: memref<64x16xf32, #tpu.memory_space<vmem>>, %arg9: memref<16x64xf32, #tpu.memory_space<vmem>>, %arg10: memref<64x32xbf16, #tpu.memory_space<vmem>>, %arg11: memref<32x32xbf16, #tpu.memory_space<vmem>>, %arg12: memref<32x128xbf16, #tpu.memory_space<vmem>>, %arg13: memref<1x128xf32, #tpu.memory_space<vmem>>, %arg14: memref<2x128xf32, #tpu.memory_space<vmem>>) attributes {dimension_semantics = [], scalar_prefetch = 0 : i64, scratch_operands = 0 : i64, tpu.core_type = #tpu.core_type<tc>} {
    %c0 = arith.constant 0 : index
    %c0_0 = arith.constant 0 : index
    %0 = vector.load %arg0[%c0, %c0_0] : memref<2x1024xf32, #tpu.memory_space<vmem>>, vector<2x1024xf32>
    %1 = arith.truncf %0 : vector<2x1024xf32> to vector<2x1024xbf16>
    %c0_1 = arith.constant 0 : index
    %c0_2 = arith.constant 0 : index
    %2 = vector.load %arg1[%c0_1, %c0_2] : memref<1024x256xbf16, #tpu.memory_space<vmem>>, vector<1024x256xbf16>
    %cst = arith.constant dense<0.000000e+00> : vector<2x256xf32>
    %3 = tpu.matmul %1, %2, %cst {dimension_numbers = #tpu.dot_dimension_numbers<[1], [0], [0], [1], [0, 0, 1, 1], [], []>} : vector<2x1024xbf16>, vector<1024x256xbf16>, vector<2x256xf32> -> vector<2x256xf32>
    %c0_3 = arith.constant 0 : index
    %c0_4 = arith.constant 0 : index
    %4 = vector.load %arg2[%c0_3, %c0_4] : memref<256x4xf32, #tpu.memory_space<vmem>>, vector<256x4xf32>
    %c0_5 = arith.constant 0 : index
    %c0_6 = arith.constant 0 : index
    %5 = vector.load %arg3[%c0_5, %c0_6] : memref<4x256xf32, #tpu.memory_space<vmem>>, vector<4x256xf32>
    %6 = arith.mulf %3, %3 : vector<2x256xf32>
    %7 = tpu.concatenate %3, %6 in 0 : vector<2x256xf32>, vector<2x256xf32> -> vector<4x256xf32>
    %cst_7 = arith.constant dense<0.000000e+00> : vector<4x4xf32>
    %8 = tpu.matmul %7, %4, %cst_7 {dimension_numbers = #tpu.dot_dimension_numbers<[1], [0], [0], [1], [0, 0, 1, 1], [], []>, precision = #tpu.contract_precision<fp32>} : vector<4x256xf32>, vector<256x4xf32>, vector<4x4xf32> -> vector<4x4xf32>
    %9 = vector.extract_strided_slice %8 {offsets = [0, 0], sizes = [2, 4], strides = [1, 1]} : vector<4x4xf32> to vector<2x4xf32>
    %cst_8 = arith.constant dense<0.000000e+00> : vector<4xf32>
    %10 = vector.multi_reduction <add>, %9, %cst_8 [0] : vector<2x4xf32> to vector<4xf32>
    %11 = vector.shape_cast %10 : vector<4xf32> to vector<1x4xf32>
    %cst_9 = arith.constant 7.812500e-03 : f32
    %12 = vector.broadcast %cst_9 : f32 to vector<1x4xf32>
    %13 = arith.mulf %11, %12 : vector<1x4xf32>
    %14 = vector.extract_strided_slice %8 {offsets = [2, 0], sizes = [2, 4], strides = [1, 1]} : vector<4x4xf32> to vector<2x4xf32>
    %cst_10 = arith.constant dense<0.000000e+00> : vector<4xf32>
    %15 = vector.multi_reduction <add>, %14, %cst_10 [0] : vector<2x4xf32> to vector<4xf32>
    %16 = vector.shape_cast %15 : vector<4xf32> to vector<1x4xf32>
    %cst_11 = arith.constant 7.812500e-03 : f32
    %17 = vector.broadcast %cst_11 : f32 to vector<1x4xf32>
    %18 = arith.mulf %16, %17 : vector<1x4xf32>
    %19 = arith.mulf %13, %13 : vector<1x4xf32>
    %20 = arith.subf %18, %19 : vector<1x4xf32>
    %cst_12 = arith.constant 0.000000e+00 : f32
    %21 = vector.broadcast %cst_12 : f32 to vector<1x4xf32>
    %22 = arith.maximumf %20, %21 : vector<1x4xf32>
    %cst_13 = arith.constant 9.99999974E-6 : f32
    %23 = vector.broadcast %cst_13 : f32 to vector<1x4xf32>
    %24 = arith.addf %22, %23 : vector<1x4xf32>
    %25 = math.rsqrt %24 : vector<1x4xf32>
    %26 = tpu.concatenate %13, %25 in 0 : vector<1x4xf32>, vector<1x4xf32> -> vector<2x4xf32>
    %cst_14 = arith.constant dense<0.000000e+00> : vector<2x256xf32>
    %27 = tpu.matmul %26, %5, %cst_14 {dimension_numbers = #tpu.dot_dimension_numbers<[1], [0], [0], [1], [0, 0, 1, 1], [], []>, precision = #tpu.contract_precision<fp32>} : vector<2x4xf32>, vector<4x256xf32>, vector<2x256xf32> -> vector<2x256xf32>
    %28 = vector.extract_strided_slice %27 {offsets = [0, 0], sizes = [1, 256], strides = [1, 1]} : vector<2x256xf32> to vector<1x256xf32>
    %29 = vector.broadcast %28 : vector<1x256xf32> to vector<2x256xf32>
    %30 = arith.subf %3, %29 : vector<2x256xf32>
    %31 = vector.extract_strided_slice %27 {offsets = [1, 0], sizes = [1, 256], strides = [1, 1]} : vector<2x256xf32> to vector<1x256xf32>
    %32 = vector.broadcast %31 : vector<1x256xf32> to vector<2x256xf32>
    %33 = arith.mulf %30, %32 : vector<2x256xf32>
    %cst_15 = arith.constant 0.000000e+00 : f32
    %34 = vector.broadcast %cst_15 : f32 to vector<2x256xf32>
    %35 = arith.maximumf %33, %34 : vector<2x256xf32>
    %36 = arith.truncf %35 : vector<2x256xf32> to vector<2x256xbf16>
    %c0_16 = arith.constant 0 : index
    %c0_17 = arith.constant 0 : index
    %37 = vector.load %arg4[%c0_16, %c0_17] : memref<256x128xbf16, #tpu.memory_space<vmem>>, vector<256x128xbf16>
    %cst_18 = arith.constant dense<0.000000e+00> : vector<2x128xf32>
    %38 = tpu.matmul %36, %37, %cst_18 {dimension_numbers = #tpu.dot_dimension_numbers<[1], [0], [0], [1], [0, 0, 1, 1], [], []>} : vector<2x256xbf16>, vector<256x128xbf16>, vector<2x128xf32> -> vector<2x128xf32>
    %c0_19 = arith.constant 0 : index
    %c0_20 = arith.constant 0 : index
    %39 = vector.load %arg5[%c0_19, %c0_20] : memref<128x8xf32, #tpu.memory_space<vmem>>, vector<128x8xf32>
    %c0_21 = arith.constant 0 : index
    %c0_22 = arith.constant 0 : index
    %40 = vector.load %arg6[%c0_21, %c0_22] : memref<8x128xf32, #tpu.memory_space<vmem>>, vector<8x128xf32>
    %41 = arith.mulf %38, %38 : vector<2x128xf32>
    %42 = tpu.concatenate %38, %41 in 0 : vector<2x128xf32>, vector<2x128xf32> -> vector<4x128xf32>
    %cst_23 = arith.constant dense<0.000000e+00> : vector<4x8xf32>
    %43 = tpu.matmul %42, %39, %cst_23 {dimension_numbers = #tpu.dot_dimension_numbers<[1], [0], [0], [1], [0, 0, 1, 1], [], []>, precision = #tpu.contract_precision<fp32>} : vector<4x128xf32>, vector<128x8xf32>, vector<4x8xf32> -> vector<4x8xf32>
    %44 = vector.extract_strided_slice %43 {offsets = [0, 0], sizes = [2, 8], strides = [1, 1]} : vector<4x8xf32> to vector<2x8xf32>
    %cst_24 = arith.constant dense<0.000000e+00> : vector<8xf32>
    %45 = vector.multi_reduction <add>, %44, %cst_24 [0] : vector<2x8xf32> to vector<8xf32>
    %46 = vector.shape_cast %45 : vector<8xf32> to vector<1x8xf32>
    %cst_25 = arith.constant 3.125000e-02 : f32
    %47 = vector.broadcast %cst_25 : f32 to vector<1x8xf32>
    %48 = arith.mulf %46, %47 : vector<1x8xf32>
    %49 = vector.extract_strided_slice %43 {offsets = [2, 0], sizes = [2, 8], strides = [1, 1]} : vector<4x8xf32> to vector<2x8xf32>
    %cst_26 = arith.constant dense<0.000000e+00> : vector<8xf32>
    %50 = vector.multi_reduction <add>, %49, %cst_26 [0] : vector<2x8xf32> to vector<8xf32>
    %51 = vector.shape_cast %50 : vector<8xf32> to vector<1x8xf32>
    %cst_27 = arith.constant 3.125000e-02 : f32
    %52 = vector.broadcast %cst_27 : f32 to vector<1x8xf32>
    %53 = arith.mulf %51, %52 : vector<1x8xf32>
    %54 = arith.mulf %48, %48 : vector<1x8xf32>
    %55 = arith.subf %53, %54 : vector<1x8xf32>
    %cst_28 = arith.constant 0.000000e+00 : f32
    %56 = vector.broadcast %cst_28 : f32 to vector<1x8xf32>
    %57 = arith.maximumf %55, %56 : vector<1x8xf32>
    %cst_29 = arith.constant 9.99999974E-6 : f32
    %58 = vector.broadcast %cst_29 : f32 to vector<1x8xf32>
    %59 = arith.addf %57, %58 : vector<1x8xf32>
    %60 = math.rsqrt %59 : vector<1x8xf32>
    %61 = tpu.concatenate %48, %60 in 0 : vector<1x8xf32>, vector<1x8xf32> -> vector<2x8xf32>
    %cst_30 = arith.constant dense<0.000000e+00> : vector<2x128xf32>
    %62 = tpu.matmul %61, %40, %cst_30 {dimension_numbers = #tpu.dot_dimension_numbers<[1], [0], [0], [1], [0, 0, 1, 1], [], []>, precision = #tpu.contract_precision<fp32>} : vector<2x8xf32>, vector<8x128xf32>, vector<2x128xf32> -> vector<2x128xf32>
    %63 = vector.extract_strided_slice %62 {offsets = [0, 0], sizes = [1, 128], strides = [1, 1]} : vector<2x128xf32> to vector<1x128xf32>
    %64 = vector.broadcast %63 : vector<1x128xf32> to vector<2x128xf32>
    %65 = arith.subf %38, %64 : vector<2x128xf32>
    %66 = vector.extract_strided_slice %62 {offsets = [1, 0], sizes = [1, 128], strides = [1, 1]} : vector<2x128xf32> to vector<1x128xf32>
    %67 = vector.broadcast %66 : vector<1x128xf32> to vector<2x128xf32>
    %68 = arith.mulf %65, %67 : vector<2x128xf32>
    %cst_31 = arith.constant 0.000000e+00 : f32
    %69 = vector.broadcast %cst_31 : f32 to vector<2x128xf32>
    %70 = arith.maximumf %68, %69 : vector<2x128xf32>
    %71 = arith.truncf %70 : vector<2x128xf32> to vector<2x128xbf16>
    %c0_32 = arith.constant 0 : index
    %c0_33 = arith.constant 0 : index
    %72 = vector.load %arg7[%c0_32, %c0_33] : memref<128x64xbf16, #tpu.memory_space<vmem>>, vector<128x64xbf16>
    %cst_34 = arith.constant dense<0.000000e+00> : vector<2x64xf32>
    %73 = tpu.matmul %71, %72, %cst_34 {dimension_numbers = #tpu.dot_dimension_numbers<[1], [0], [0], [1], [0, 0, 1, 1], [], []>} : vector<2x128xbf16>, vector<128x64xbf16>, vector<2x64xf32> -> vector<2x64xf32>
    %c0_35 = arith.constant 0 : index
    %c0_36 = arith.constant 0 : index
    %74 = vector.load %arg8[%c0_35, %c0_36] : memref<64x16xf32, #tpu.memory_space<vmem>>, vector<64x16xf32>
    %c0_37 = arith.constant 0 : index
    %c0_38 = arith.constant 0 : index
    %75 = vector.load %arg9[%c0_37, %c0_38] : memref<16x64xf32, #tpu.memory_space<vmem>>, vector<16x64xf32>
    %76 = arith.mulf %73, %73 : vector<2x64xf32>
    %77 = tpu.concatenate %73, %76 in 0 : vector<2x64xf32>, vector<2x64xf32> -> vector<4x64xf32>
    %cst_39 = arith.constant dense<0.000000e+00> : vector<4x16xf32>
    %78 = tpu.matmul %77, %74, %cst_39 {dimension_numbers = #tpu.dot_dimension_numbers<[1], [0], [0], [1], [0, 0, 1, 1], [], []>, precision = #tpu.contract_precision<fp32>} : vector<4x64xf32>, vector<64x16xf32>, vector<4x16xf32> -> vector<4x16xf32>
    %79 = vector.extract_strided_slice %78 {offsets = [0, 0], sizes = [2, 16], strides = [1, 1]} : vector<4x16xf32> to vector<2x16xf32>
    %cst_40 = arith.constant dense<0.000000e+00> : vector<16xf32>
    %80 = vector.multi_reduction <add>, %79, %cst_40 [0] : vector<2x16xf32> to vector<16xf32>
    %81 = vector.shape_cast %80 : vector<16xf32> to vector<1x16xf32>
    %cst_41 = arith.constant 1.250000e-01 : f32
    %82 = vector.broadcast %cst_41 : f32 to vector<1x16xf32>
    %83 = arith.mulf %81, %82 : vector<1x16xf32>
    %84 = vector.extract_strided_slice %78 {offsets = [2, 0], sizes = [2, 16], strides = [1, 1]} : vector<4x16xf32> to vector<2x16xf32>
    %cst_42 = arith.constant dense<0.000000e+00> : vector<16xf32>
    %85 = vector.multi_reduction <add>, %84, %cst_42 [0] : vector<2x16xf32> to vector<16xf32>
    %86 = vector.shape_cast %85 : vector<16xf32> to vector<1x16xf32>
    %cst_43 = arith.constant 1.250000e-01 : f32
    %87 = vector.broadcast %cst_43 : f32 to vector<1x16xf32>
    %88 = arith.mulf %86, %87 : vector<1x16xf32>
    %89 = arith.mulf %83, %83 : vector<1x16xf32>
    %90 = arith.subf %88, %89 : vector<1x16xf32>
    %cst_44 = arith.constant 0.000000e+00 : f32
    %91 = vector.broadcast %cst_44 : f32 to vector<1x16xf32>
    %92 = arith.maximumf %90, %91 : vector<1x16xf32>
    %cst_45 = arith.constant 9.99999974E-6 : f32
    %93 = vector.broadcast %cst_45 : f32 to vector<1x16xf32>
    %94 = arith.addf %92, %93 : vector<1x16xf32>
    %95 = math.rsqrt %94 : vector<1x16xf32>
    %96 = tpu.concatenate %83, %95 in 0 : vector<1x16xf32>, vector<1x16xf32> -> vector<2x16xf32>
    %cst_46 = arith.constant dense<0.000000e+00> : vector<2x64xf32>
    %97 = tpu.matmul %96, %75, %cst_46 {dimension_numbers = #tpu.dot_dimension_numbers<[1], [0], [0], [1], [0, 0, 1, 1], [], []>, precision = #tpu.contract_precision<fp32>} : vector<2x16xf32>, vector<16x64xf32>, vector<2x64xf32> -> vector<2x64xf32>
    %98 = vector.extract_strided_slice %97 {offsets = [0, 0], sizes = [1, 64], strides = [1, 1]} : vector<2x64xf32> to vector<1x64xf32>
    %99 = vector.broadcast %98 : vector<1x64xf32> to vector<2x64xf32>
    %100 = arith.subf %73, %99 : vector<2x64xf32>
    %101 = vector.extract_strided_slice %97 {offsets = [1, 0], sizes = [1, 64], strides = [1, 1]} : vector<2x64xf32> to vector<1x64xf32>
    %102 = vector.broadcast %101 : vector<1x64xf32> to vector<2x64xf32>
    %103 = arith.mulf %100, %102 : vector<2x64xf32>
    %cst_47 = arith.constant 0.000000e+00 : f32
    %104 = vector.broadcast %cst_47 : f32 to vector<2x64xf32>
    %105 = arith.maximumf %103, %104 : vector<2x64xf32>
    %106 = arith.truncf %105 : vector<2x64xf32> to vector<2x64xbf16>
    %c0_48 = arith.constant 0 : index
    %c0_49 = arith.constant 0 : index
    %107 = vector.load %arg10[%c0_48, %c0_49] : memref<64x32xbf16, #tpu.memory_space<vmem>>, vector<64x32xbf16>
    %cst_50 = arith.constant dense<0.000000e+00> : vector<2x32xf32>
    %108 = tpu.matmul %106, %107, %cst_50 {dimension_numbers = #tpu.dot_dimension_numbers<[1], [0], [0], [1], [0, 0, 1, 1], [], []>} : vector<2x64xbf16>, vector<64x32xbf16>, vector<2x32xf32> -> vector<2x32xf32>
    %cst_51 = arith.constant dense<0.000000e+00> : vector<32xf32>
    %109 = vector.multi_reduction <add>, %108, %cst_51 [0] : vector<2x32xf32> to vector<32xf32>
    %110 = vector.shape_cast %109 : vector<32xf32> to vector<1x32xf32>
    %cst_52 = arith.constant 2.000000e+00 : f32
    %111 = vector.broadcast %cst_52 : f32 to vector<1x32xf32>
    %112 = arith.divf %110, %111 : vector<1x32xf32>
    %113 = vector.broadcast %112 : vector<1x32xf32> to vector<2x32xf32>
    %114 = arith.subf %108, %113 : vector<2x32xf32>
    %115 = arith.mulf %114, %114 : vector<2x32xf32>
    %cst_53 = arith.constant dense<0.000000e+00> : vector<32xf32>
    %116 = vector.multi_reduction <add>, %115, %cst_53 [0] : vector<2x32xf32> to vector<32xf32>
    %117 = vector.shape_cast %116 : vector<32xf32> to vector<1x32xf32>
    %cst_54 = arith.constant 2.000000e+00 : f32
    %118 = vector.broadcast %cst_54 : f32 to vector<1x32xf32>
    %119 = arith.divf %117, %118 : vector<1x32xf32>
    %cst_55 = arith.constant 9.99999974E-6 : f32
    %120 = vector.broadcast %cst_55 : f32 to vector<1x32xf32>
    %121 = arith.addf %119, %120 : vector<1x32xf32>
    %122 = math.rsqrt %121 : vector<1x32xf32>
    %123 = vector.broadcast %122 : vector<1x32xf32> to vector<2x32xf32>
    %124 = arith.mulf %114, %123 : vector<2x32xf32>
    %cst_56 = arith.constant 0.000000e+00 : f32
    %125 = vector.broadcast %cst_56 : f32 to vector<2x32xf32>
    %126 = arith.maximumf %124, %125 : vector<2x32xf32>
    %127 = arith.truncf %126 : vector<2x32xf32> to vector<2x32xbf16>
    %c0_57 = arith.constant 0 : index
    %c0_58 = arith.constant 0 : index
    %128 = vector.load %arg11[%c0_57, %c0_58] : memref<32x32xbf16, #tpu.memory_space<vmem>>, vector<32x32xbf16>
    %cst_59 = arith.constant dense<0.000000e+00> : vector<2x32xf32>
    %129 = tpu.matmul %127, %128, %cst_59 {dimension_numbers = #tpu.dot_dimension_numbers<[1], [0], [0], [1], [0, 0, 1, 1], [], []>} : vector<2x32xbf16>, vector<32x32xbf16>, vector<2x32xf32> -> vector<2x32xf32>
    %cst_60 = arith.constant dense<0.000000e+00> : vector<32xf32>
    %130 = vector.multi_reduction <add>, %129, %cst_60 [0] : vector<2x32xf32> to vector<32xf32>
    %131 = vector.shape_cast %130 : vector<32xf32> to vector<1x32xf32>
    %cst_61 = arith.constant 2.000000e+00 : f32
    %132 = vector.broadcast %cst_61 : f32 to vector<1x32xf32>
    %133 = arith.divf %131, %132 : vector<1x32xf32>
    %134 = vector.broadcast %133 : vector<1x32xf32> to vector<2x32xf32>
    %135 = arith.subf %129, %134 : vector<2x32xf32>
    %136 = arith.mulf %135, %135 : vector<2x32xf32>
    %cst_62 = arith.constant dense<0.000000e+00> : vector<32xf32>
    %137 = vector.multi_reduction <add>, %136, %cst_62 [0] : vector<2x32xf32> to vector<32xf32>
    %138 = vector.shape_cast %137 : vector<32xf32> to vector<1x32xf32>
    %cst_63 = arith.constant 2.000000e+00 : f32
    %139 = vector.broadcast %cst_63 : f32 to vector<1x32xf32>
    %140 = arith.divf %138, %139 : vector<1x32xf32>
    %cst_64 = arith.constant 9.99999974E-6 : f32
    %141 = vector.broadcast %cst_64 : f32 to vector<1x32xf32>
    %142 = arith.addf %140, %141 : vector<1x32xf32>
    %143 = math.rsqrt %142 : vector<1x32xf32>
    %144 = vector.broadcast %143 : vector<1x32xf32> to vector<2x32xf32>
    %145 = arith.mulf %135, %144 : vector<2x32xf32>
    %cst_65 = arith.constant 0.000000e+00 : f32
    %146 = vector.broadcast %cst_65 : f32 to vector<2x32xf32>
    %147 = arith.maximumf %145, %146 : vector<2x32xf32>
    %148 = arith.truncf %147 : vector<2x32xf32> to vector<2x32xbf16>
    %c0_66 = arith.constant 0 : index
    %c0_67 = arith.constant 0 : index
    %149 = vector.load %arg12[%c0_66, %c0_67] : memref<32x128xbf16, #tpu.memory_space<vmem>>, vector<32x128xbf16>
    %c0_68 = arith.constant 0 : index
    %c0_69 = arith.constant 0 : index
    %150 = vector.load %arg13[%c0_68, %c0_69] : memref<1x128xf32, #tpu.memory_space<vmem>>, vector<1x128xf32>
    %cst_70 = arith.constant dense<0.000000e+00> : vector<2x128xf32>
    %151 = tpu.matmul %148, %149, %cst_70 {dimension_numbers = #tpu.dot_dimension_numbers<[1], [0], [0], [1], [0, 0, 1, 1], [], []>} : vector<2x32xbf16>, vector<32x128xbf16>, vector<2x128xf32> -> vector<2x128xf32>
    %152 = vector.broadcast %150 : vector<1x128xf32> to vector<2x128xf32>
    %153 = arith.addf %151, %152 : vector<2x128xf32>
    %c0_71 = arith.constant 0 : index
    %c0_72 = arith.constant 0 : index
    %154 = vector.load %arg14[%c0_71, %c0_72] : memref<2x128xf32, #tpu.memory_space<vmem>>, vector<2x128xf32>
    tpu.vector_store %arg14[%c0_71, %c0_72], %153 {strides = array<i32>} : memref<2x128xf32, #tpu.memory_space<vmem>>, vector<2x128xf32>,
    return
  }
}

</mosaic_0001>

<bundles_post_ra>
// kernel: forward.1
= control target key start
LH: loop header
LB: loop body
LE: loop exit
PB: predicated region body
PF: predicated region fallthrough
CT: control target
= control target key end

     0   :  { %v7012_v7 = vmov 1983009808   ;;  %v57_v9 = vlaneseq  ;;  %s8724_s0 = inlined_call_operand.vmem [shape: f32[2,1024], index: 0, kind: input, shape index: {}]   ;;  %s8725_s1 = inlined_call_operand.vmem [shape: bf16[1024,256], index: 1, kind: input, shape index: {}]   ;;  %s8726_s2 = inlined_call_operand.vmem [shape: f32[256,4], index: 2, kind: input, shape index: {}]   ;;  %s8727_s3 = inlined_call_operand.vmem [shape: f32[4,256], index: 3, kind: input, shape index: {}]   ;;  %s8728_s4 = inlined_call_operand.vmem [shape: bf16[256,128], index: 4, kind: input, shape index: {}]   ;;  %s8729_s5 = inlined_call_operand.vmem [shape: f32[128,8], index: 5, kind: input, shape index: {}]   ;;  %s8730_s6 = inlined_call_operand.vmem [shape: f32[8,128], index: 6, kind: input, shape index: {}]   ;;  %s8731_s7 = inlined_call_operand.vmem [shape: bf16[128,64], index: 7, kind: input, shape index: {}]   ;;  %s8732_s8 = inlined_call_operand.vmem [shape: f32[64,16], index: 8, kind: input, shape index: {}]   ;;  %s8733_s9 = inlined_call_operand.vmem [shape: f32[16,64], index: 9, kind: input, shape index: {}]   ;;  %s8734_s10 = inlined_call_operand.vmem [shape: bf16[64,32], index: 10, kind: input, shape index: {}]   ;;  %s8735_s11 = inlined_call_operand.vmem [shape: bf16[32,32], index: 11, kind: input, shape index: {}]   ;;  %s8736_s12 = inlined_call_operand.vmem [shape: bf16[32,128], index: 12, kind: input, shape index: {}]   ;;  %s8737_s13 = inlined_call_operand.vmem [shape: f32[1,128], index: 13, kind: input, shape index: {}]   ;;  %s8738_s14 = inlined_call_operand.hbm [shape: f32[2,128], index: 14, kind: output, shape index: {}]  }
   0x1   :  { %v6751_v0 = vld [vmem:[%s8725_s1 + $0x4] ss:$8 sps:$4 sm:$0xff]   ;;  %v6753_v1 = vld [vmem:[%s8725_s1] ss:$8 sps:$4 sm:$0xff]   ;;  %v6754_v2 = vld [vmem:[%s8725_s1 + $0x14] ss:$8 sps:$4 sm:$0xff]   ;;  %v55_v8 = vunpack.c.l.s4 %v7012_v7 }
   0x2   :  { %871 = vmatprep.subr.bf16.mxu0 %v6751_v0  ;;  %v6756_v3 = vld [vmem:[%s8725_s1 + $0x10] ss:$8 sps:$4 sm:$0xff]   ;;  %v6757_v4 = vld [vmem:[%s8725_s1 + $0x24] ss:$8 sps:$4 sm:$0xff]   ;;  %v6759_v5 = vld [vmem:[%s8725_s1 + $0x20] ss:$8 sps:$4 sm:$0xff]  }
   0x3   :  { %872 = vmatpush1.bf16.msra.mxu0 %v6753_v1  ;;  %v6760_v6 = vld [vmem:[%s8725_s1 + $0x34] ss:$8 sps:$4 sm:$0xff]   ;;  %v6762_v10 = vld [vmem:[%s8725_s1 + $0x30] ss:$8 sps:$4 sm:$0xff]   ;;  %v6763_v11 = vld [vmem:[%s8725_s1 + $0x44] ss:$8 sps:$4 sm:$0xff]   ;;  %v56_v12 = vunpack.c.0.s8 %v55_v8 }
   0x4   :  { %873 = vmatprep.subr.bf16.mxu0 %v6754_v2  ;;  %v7119_v13 = vshrl.u32 %v57_v9, 7  ;;  %v6765_v14 = vld [vmem:[%s8725_s1 + $0x40] ss:$8 sps:$4 sm:$0xff]   ;;  %v6766_v15 = vld [vmem:[%s8725_s1 + $0x54] ss:$8 sps:$4 sm:$0xff]  }
   0x5   :  { %v6768_v17 = vld [vmem:[%s8725_s1 + $0x50] ss:$8 sps:$4 sm:$0xff]   ;;  %v6769_v18 = vld [vmem:[%s8725_s1 + $0x64] ss:$8 sps:$4 sm:$0xff]   ;;  %v6771_v21 = vld [vmem:[%s8725_s1 + $0x60] ss:$8 sps:$4 sm:$0xff]  }
   0x6   :  { %8826 = vst [vmem:[#allocation5_spill] sm:$0xff] %v7119_v13  ;;  %v7128_v16 = vsub.s32 %v56_v12, %v7119_v13  ;;  %v49_v19 = vld [vmem:[%s8724_s0] sm:$0xff]  ;;  %v6772_v22 = vld [vmem:[%s8725_s1 + $0x74] ss:$8 sps:$4 sm:$0xff]   ;;  %v6774_v25 = vld [vmem:[%s8725_s1 + $0x70] ss:$8 sps:$4 sm:$0xff]  }
   0x7   :  { %874 = vmatpush1.bf16.msra.mxu0 %v6756_v3  ;;  %v6775_v26 = vld [vmem:[%s8725_s1 + $0x84] ss:$8 sps:$4 sm:$0xff]   ;;  %v6777_v27 = vld [vmem:[%s8725_s1 + $0x80] ss:$8 sps:$4 sm:$0xff]   ;;  %v6778_v28 = vld [vmem:[%s8725_s1 + $0x94] ss:$8 sps:$4 sm:$0xff]   ;;  %v53_v38 = vcombine.high %v49_v19, %v49_v19 }
   0x8   :  { %875 = vmatprep.subr.bf16.mxu0 %v6757_v4  ;;  %v60_v20 = vrot.slane %v49_v19, %v7128_v16  ;;  %v6780_v29 = vld [vmem:[%s8725_s1 + $0x90] ss:$8 sps:$4 sm:$0xff]   ;;  %v6781_v30 = vld [vmem:[%s8725_s1 + $0xa4] ss:$8 sps:$4 sm:$0xff]   ;;  %v6783_v31 = vld [vmem:[%s8725_s1 + $0xa0] ss:$8 sps:$4 sm:$0xff]  }
   0x9   :  { %v6784_v32 = vld [vmem:[%s8725_s1 + $0xb4] ss:$8 sps:$4 sm:$0xff]   ;;  %v6786_v33 = vld [vmem:[%s8725_s1 + $0xb0] ss:$8 sps:$4 sm:$0xff]   ;;  %v6787_v34 = vld [vmem:[%s8725_s1 + $0xc4] ss:$8 sps:$4 sm:$0xff]   ;;  %v7192_v41 = vrot.slane %v53_v38, %v7128_v16 }
   0xa   :  { %v68_v23 = vcombine.high %v60_v20, %v60_v20  ;;  %v6789_v35 = vld [vmem:[%s8725_s1 + $0xc0] ss:$8 sps:$4 sm:$0xff]   ;;  %v6790_v36 = vld [vmem:[%s8725_s1 + $0xd4] ss:$8 sps:$4 sm:$0xff]   ;;  %v6792_v37 = vld [vmem:[%s8725_s1 + $0xd0] ss:$8 sps:$4 sm:$0xff]   ;;  %v95_v46 = vpack.c.bf16 %v60_v20, %v60_v20 }
   0xb   :  { %876 = vmatpush1.bf16.msra.mxu0 %v6759_v5  ;;  %v6793_v39 = vld [vmem:[%s8725_s1 + $0xe4] ss:$8 sps:$4 sm:$0xff]   ;;  %v6795_v40 = vld [vmem:[%s8725_s1 + $0xe0] ss:$8 sps:$4 sm:$0xff]   ;;  %v6796_v42 = vld [vmem:[%s8725_s1 + $0xf4] ss:$8 sps:$4 sm:$0xff]   ;;  %v69_v44 = vcombine.high %v7192_v41, %v7192_v41 }
   0xc   :  { %877 = vmatprep.subr.bf16.mxu0 %v6760_v6  ;;  %v96_v24 = vpack.c.bf16 %v68_v23, %v68_v23  ;;  %v6798_v43 = vld [vmem:[%s8725_s1 + $0xf0] ss:$8 sps:$4 sm:$0xff]   ;;  %v6802_v45 = vld [vmem:[%s8725_s1 + $0x104] ss:$8 sps:$4 sm:$0xff]   ;;  %v6800_v47 = vld [vmem:[%s8725_s1 + $0x100] ss:$8 sps:$4 sm:$0xff]  }
   0xd   :  { %v98_v48 = vpack.c.bf16 %v69_v44, %v69_v44  ;;  %v6805_v49 = vld [vmem:[%s8725_s1 + $0x114] ss:$8 sps:$4 sm:$0xff]   ;;  %v6803_v50 = vld [vmem:[%s8725_s1 + $0x110] ss:$8 sps:$4 sm:$0xff]   ;;  %v6808_v51 = vld [vmem:[%s8725_s1 + $0x124] ss:$8 sps:$4 sm:$0xff]  }
   0xe   :  { %903 = vmatprep.mubr.bf16.mxu0 %v96_v24  ;;  %v6806_v52 = vld [vmem:[%s8725_s1 + $0x120] ss:$8 sps:$4 sm:$0xff]   ;;  %v6811_v53 = vld [vmem:[%s8725_s1 + $0x134] ss:$8 sps:$4 sm:$0xff]   ;;  %v6809_v54 = vld [vmem:[%s8725_s1 + $0x130] ss:$8 sps:$4 sm:$0xff]  }
   0xf   :  { %878 = vmatpush1.bf16.msra.mxu0 %v6762_v10  ;;  %v6814_v55 = vld [vmem:[%s8725_s1 + $0x144] ss:$8 sps:$4 sm:$0xff]   ;;  %v6812_v56 = vld [vmem:[%s8725_s1 + $0x140] ss:$8 sps:$4 sm:$0xff]   ;;  %v6817_v57 = vld [vmem:[%s8725_s1 + $0x154] ss:$8 sps:$4 sm:$0xff]  }
  0x10   :  { %879 = vmatprep.subr.bf16.mxu0 %v6763_v11  ;;  %v6815_v58 = vld [vmem:[%s8725_s1 + $0x150] ss:$8 sps:$4 sm:$0xff]   ;;  %v6820_v59 = vld [vmem:[%s8725_s1 + $0x164] ss:$8 sps:$4 sm:$0xff]   ;;  %v6818_v60 = vld [vmem:[%s8725_s1 + $0x160] ss:$8 sps:$4 sm:$0xff]  }
  0x11   :  { %v6823_v61 = vld [vmem:[%s8725_s1 + $0x174] ss:$8 sps:$4 sm:$0xff]   ;;  %v6821_v62 = vld [vmem:[%s8725_s1 + $0x170] ss:$8 sps:$4 sm:$0xff]   ;;  %v6826_v63 = vld [vmem:[%s8725_s1 + $0x184] ss:$8 sps:$4 sm:$0xff]  }
  0x12   :  { %v6824_v0 = vld [vmem:[%s8725_s1 + $0x180] ss:$8 sps:$4 sm:$0xff]   ;;  %v6829_v1 = vld [vmem:[%s8725_s1 + $0x194] ss:$8 sps:$4 sm:$0xff]   ;;  %v6827_v2 = vld [vmem:[%s8725_s1 + $0x190] ss:$8 sps:$4 sm:$0xff]  }
  0x13   :  { %880 = vmatpush1.bf16.msra.mxu0 %v6765_v14  ;;  %v6832_v3 = vld [vmem:[%s8725_s1 + $0x1a4] ss:$8 sps:$4 sm:$0xff]   ;;  %v6830_v4 = vld [vmem:[%s8725_s1 + $0x1a0] ss:$8 sps:$4 sm:$0xff]   ;;  %v6835_v5 = vld [vmem:[%s8725_s1 + $0x1b4] ss:$8 sps:$4 sm:$0xff]  }
  0x14   :  { %881 = vmatprep.subr.bf16.mxu0 %v6766_v15 }
  0x17   :  { %882 = vmatpush1.bf16.msra.mxu0 %v6768_v17 }
  0x18   :  { %883 = vmatprep.subr.bf16.mxu0 %v6769_v18 }
  0x1b   :  { %884 = vmatpush1.bf16.msra.mxu0 %v6771_v21 }
  0x1c   :  { %885 = vmatprep.subr.bf16.mxu0 %v6772_v22 }
  0x1f   :  { %886 = vmatpush1.bf16.msra.mxu0 %v6774_v25 }
  0x20   :  { %887 = vmatprep.subr.bf16.mxu0 %v6775_v26 }
  0x23   :  { %888 = vmatpush1.bf16.msra.mxu0 %v6777_v27 }
  0x24   :  { %889 = vmatprep.subr.bf16.mxu0 %v6778_v28 }
  0x27   :  { %890 = vmatpush1.bf16.msra.mxu0 %v6780_v29 }
  0x28   :  { %891 = vmatprep.subr.bf16.mxu0 %v6781_v30 }
  0x2b   :  { %892 = vmatpush1.bf16.msra.mxu0 %v6783_v31 }
  0x2c   :  { %893 = vmatprep.subr.bf16.mxu0 %v6784_v32 }
  0x2f   :  { %894 = vmatpush1.bf16.msra.mxu0 %v6786_v33 }
  0x30   :  { %895 = vmatprep.subr.bf16.mxu0 %v6787_v34 }
  0x33   :  { %896 = vmatpush1.bf16.msra.mxu0 %v6789_v35 }
  0x34   :  { %897 = vmatprep.subr.bf16.mxu0 %v6790_v36 }
  0x37   :  { %898 = vmatpush1.bf16.msra.mxu0 %v6792_v37 }
  0x38   :  { %899 = vmatprep.subr.bf16.mxu0 %v6793_v39 }
  0x3b   :  { %900 = vmatpush1.bf16.msra.mxu0 %v6795_v40 }
  0x3c   :  { %901 = vmatprep.subr.bf16.mxu0 %v6796_v42 }
  0x3f   :  { %902 = vmatpush1.bf16.msra.mxu0 %v6798_v43 }
  0x40   :  { %912 = vmatprep.subr.bf16.mxu0 %v6802_v45 }
  0x42   :  { %904 = vmatmul.mubr.bf16.vlgmr.msra.gmra.mrb[0].mxu0 %v95_v46 }
  0x43   :  { %913 = vmatpush1.bf16.msra.mxu0 %v6800_v47  ;;  %944 = vmatprep.mubr.bf16.mxu0 %v98_v48 }
  0x44   :  { %914 = vmatprep.subr.bf16.mxu0 %v6805_v49 }
  0x47   :  { %915 = vmatpush1.bf16.msra.mxu0 %v6803_v50 }
  0x48   :  { %916 = vmatprep.subr.bf16.mxu0 %v6808_v51 }
  0x4b   :  { %917 = vmatpush1.bf16.msra.mxu0 %v6806_v52 }
  0x4c   :  { %918 = vmatprep.subr.bf16.mxu0 %v6811_v53 }
  0x4f   :  { %919 = vmatpush1.bf16.msra.mxu0 %v6809_v54 }
  0x50   :  { %920 = vmatprep.subr.bf16.mxu0 %v6814_v55 }
  0x53   :  { %921 = vmatpush1.bf16.msra.mxu0 %v6812_v56 }
  0x54   :  { %922 = vmatprep.subr.bf16.mxu0 %v6817_v57 }
  0x57   :  { %923 = vmatpush1.bf16.msra.mxu0 %v6815_v58 }
  0x58   :  { %924 = vmatprep.subr.bf16.mxu0 %v6820_v59 }
  0x5b   :  { %925 = vmatpush1.bf16.msra.mxu0 %v6818_v60 }
  0x5c   :  { %926 = vmatprep.subr.bf16.mxu0 %v6823_v61 }
  0x5f   :  { %927 = vmatpush1.bf16.msra.mxu0 %v6821_v62 }
  0x60   :  { %928 = vmatprep.subr.bf16.mxu0 %v6826_v63 }
  0x63   :  { %929 = vmatpush1.bf16.msra.mxu0 %v6824_v0 }
  0x64   :  { %930 = vmatprep.subr.bf16.mxu0 %v6829_v1 }
  0x67   :  { %931 = vmatpush1.bf16.msra.mxu0 %v6827_v2 }
  0x68   :  { %932 = vmatprep.subr.bf16.mxu0 %v6832_v3 }
  0x69   :  { %19 = vsyncpa [#allocation3], 0  ;;  %v6833_v6 = vld [vmem:[%s8725_s1 + $0x1b0] ss:$8 sps:$4 sm:$0xff]   ;;  %v6838_v7 = vld [vmem:[%s8725_s1 + $0x1c4] ss:$8 sps:$4 sm:$0xff]   ;;  %v97_v21 = vpack.c.bf16 %v7192_v41, %v7192_v41 }
  0x6a   :  { %v6836_v8 = vld [vmem:[%s8725_s1 + $0x1c0] ss:$8 sps:$4 sm:$0xff]   ;;  %v6841_v9 = vld [vmem:[%s8725_s1 + $0x1d4] ss:$8 sps:$4 sm:$0xff]   ;;  %v6839_v10 = vld [vmem:[%s8725_s1 + $0x1d0] ss:$8 sps:$4 sm:$0xff]  }
  0x6b   :  { %933 = vmatpush1.bf16.msra.mxu0 %v6830_v4  ;;  %v6844_v11 = vld [vmem:[%s8725_s1 + $0x1e4] ss:$8 sps:$4 sm:$0xff]   ;;  %v6842_v14 = vld [vmem:[%s8725_s1 + $0x1e0] ss:$8 sps:$4 sm:$0xff]   ;;  %v6847_v17 = vld [vmem:[%s8725_s1 + $0x1f4] ss:$8 sps:$4 sm:$0xff]  }
  0x6c   :  { %934 = vmatprep.subr.bf16.mxu0 %v6835_v5  ;;  %v7292_v12 = vld [vmem:[%s8724_s0 + $0x8] sm:$0xff]  ;;  %v6845_v18 = vld [vmem:[%s8725_s1 + $0x1f0] ss:$8 sps:$4 sm:$0xff]   ;;  %v6853_v24 = vld [vmem:[%s8725_s1 + $0x214] ss:$8 sps:$4 sm:$0xff]   ;;  %vm1076_vm0 = vcmask 1041408  }
  0x6d   :  { %v7299_v15 = vrot.slane %v7292_v12, %v7128_v16  ;;  %v6850_v20 = vld [vmem:[%s8725_s1 + $0x204] ss:$8 sps:$4 sm:$0xff]   ;;  %v6848_v22 = vld [vmem:[%s8725_s1 + $0x200] ss:$8 sps:$4 sm:$0xff]   ;;  %v6851_v25 = vld [vmem:[%s8725_s1 + $0x210] ss:$8 sps:$4 sm:$0xff]  }
  0x6e   :  { %v6856_v26 = vld [vmem:[%s8725_s1 + $0x224] ss:$8 sps:$4 sm:$0xff]   ;;  %v1053_v34 = vld [vmem:[%s8726_s2 + $0x90] sm:$0xff]  ;;  %v1054_v35 = vld [vmem:[%s8726_s2 + $0x98] sm:$0xff]  ;;  %vm1974_vm1 = vcmask 1043456   ;;  %vm1941_vm2 = vcmask 25600  }
  0x6f   :  { %935 = vmatpush1.bf16.msra.mxu0 %v6833_v6  ;;  %v85_v19 = vcombine.high %v7299_v15, %v7299_v15  ;;  %v1051_v27 = vld [vmem:[%s8726_s2 + $0x80] sm:$0xff]  ;;  %v1052_v28 = vld [vmem:[%s8726_s2 + $0x88] sm:$0xff]  ;;  %v1134_v37 = vand.u32 4294901760, %v1053_v34  ;;  %v1137_v38 = vand.u32 4294901760, %v1054_v35  ;;  %v1037_v39 = vld [vmem:[%s8726_s2 + $0x10] sm:$0xff]  ;;  %vm1966_vm3 = vcmask 1040384  }
  0x70   :  { %936 = vmatprep.subr.bf16.mxu0 %v6838_v7  ;;  %v1035_v29 = vld [vmem:[%s8726_s2] sm:$0xff]  ;;  %v1128_v30 = vand.u32 4294901760, %v1051_v27  ;;  %v1131_v31 = vand.u32 4294901760, %v1052_v28  ;;  %v1036_v32 = vld [vmem:[%s8726_s2 + $0x8] sm:$0xff]  ;;  %v1038_v40 = vld [vmem:[%s8726_s2 + $0x18] sm:$0xff]  ;;  %v1086_v57 = vand.u32 4294901760, %v1037_v39 }
  0x71   :  { %v100_v23 = vpack.c.bf16 %v85_v19, %v85_v19  ;;  %v1080_v33 = vand.u32 4294901760, %v1035_v29  ;;  %v1083_v36 = vand.u32 4294901760, %v1036_v32  ;;  %v1055_v41 = vld [vmem:[%s8726_s2 + $0xa0] sm:$0xff]  ;;  %v1056_v46 = vld [vmem:[%s8726_s2 + $0xa8] sm:$0xff]  ;;  %v7377_v52 = vpack.c.bf16 %v1137_v38, %v1134_v37  ;;  %v1057_v54 = vld [vmem:[%s8726_s2 + $0xb0] sm:$0xff]  ;;  %s7016_s22 = smov [#allocation2]  }
  0x72   :  { %v7353_v42 = vpack.c.bf16 %v1131_v31, %v1128_v30  ;;  %v7355_v43 = vsub.f32 %v1051_v27, %v1128_v30  ;;  %v7357_v44 = vsub.f32 %v1052_v28, %v1131_v31  ;;  %v1039_v47 = vld [vmem:[%s8726_s2 + $0x20] sm:$0xff]  ;;  %v1040_v48 = vld [vmem:[%s8726_s2 + $0x28] sm:$0xff]  ;;  %v7379_v53 = vsub.f32 %v1053_v34, %v1134_v37  ;;  %v6859_v55 = vld [vmem:[%s8725_s1 + $0x234] ss:$8 sps:$4 sm:$0xff]   ;;  %s5204_s23 = sshll.u32 %s7016_s22, 4  ;;  %s5205_s23 = int_to_ptr.vmem [resolvable:$true] %s5204_s23 }
  0x73   :  { %937 = vmatpush1.bf16.msra.mxu0 %v6836_v8  ;;  %v7359_v45 = vsub.f32 %v1035_v29, %v1080_v33  ;;  %v6854_v49 = vld [vmem:[%s8725_s1 + $0x220] ss:$8 sps:$4 sm:$0xff]   ;;  %v7373_v50 = vpack.c.bf16 %v1083_v36, %v1080_v33  ;;  %v7375_v51 = vsub.f32 %v1036_v32, %v1083_v36  ;;  %8827 = vst [vmem:[#allocation6_spill] sm:$0xff] %v7377_v52  ;;  %v1089_v58 = vand.u32 4294901760, %v1038_v40  ;;  %v1058_v63 = vld [vmem:[%s8726_s2 + $0xb8] sm:$0xff]  ;;  %v1041_v1 = vld [vmem:[%s8726_s2 + $0x30] sm:$0xff]  ;;  %p6993_p1 = scmp.lt.s32.totalorder %s5205_s23, %s5205_s23 }
  0x74   :  { %938 = vmatprep.subr.bf16.mxu0 %v6841_v9  ;;  %6259 = vmatprep.subr.bf16.mxu1 %v7353_v42  ;;  %v7388_v56 = vsub.f32 %v1054_v35, %v1137_v38  ;;  %v1140_v59 = vand.u32 4294901760, %v1055_v41  ;;  %v1143_v60 = vand.u32 4294901760, %v1056_v46  ;;  %v1092_v61 = vand.u32 4294901760, %v1039_v47  ;;  %v1042_v6 = vld [vmem:[%s8726_s2 + $0x38] sm:$0xff]  ;;  %v6862_v19 = vld [vmem:[%s8725_s1 + $0x244] ss:$8 sps:$4 sm:$0xff]  }
  0x75   :  { %6261 = vmatpush3.bf16.msra.mxu1 %v7373_v50  ;;  %v1095_v62 = vand.u32 4294901760, %v1040_v48  ;;  %v1146_v0 = vand.u32 4294901760, %v1057_v54  ;;  %v7398_v2 = vpack.c.bf16 %v1089_v58, %v1086_v57  ;;  %v7400_v3 = vsub.f32 %v1037_v39, %v1086_v57  ;;  %v6865_v27 = vld [vmem:[%s8725_s1 + $0x254] ss:$8 sps:$4 sm:$0xff]   ;;  %v6863_v29 = vld [vmem:[%s8725_s1 + $0x250] ss:$8 sps:$4 sm:$0xff]  }
  0x76   :  { %6263 = vmatprep.subr.bf16.mxu1 %v7377_v52  ;;  %v7402_v4 = vsub.f32 %v1038_v40, %v1089_v58  ;;  %v7404_v5 = vsub.f32 %v1055_v41, %v1140_v59  ;;  %v7409_v7 = vpack.c.bf16 %v1143_v60, %v1140_v59  ;;  %v7411_v8 = vsub.f32 %v1056_v46, %v1143_v60  ;;  %v6868_v30 = vld [vmem:[%s8725_s1 + $0x264] ss:$8 sps:$4 sm:$0xff]   ;;  %v6866_v31 = vld [vmem:[%s8725_s1 + $0x260] ss:$8 sps:$4 sm:$0xff]   ;;  %v6871_v32 = vld [vmem:[%s8725_s1 + $0x274] ss:$8 sps:$4 sm:$0xff]  }
  0x77   :  { %939 = vmatpush1.bf16.msra.mxu0 %v6839_v10  ;;  %8828 = vst [vmem:[#allocation7_spill] sm:$0xff] %v7398_v2  ;;  %v7413_v9 = vsub.f32 %v1039_v47, %v1092_v61  ;;  %v6857_v10 = vld [vmem:[%s8725_s1 + $0x230] ss:$8 sps:$4 sm:$0xff]   ;;  %v6874_v34 = vld [vmem:[%s8725_s1 + $0x284] ss:$8 sps:$4 sm:$0xff]   ;;  %vm1970_vm4 = vcmask 31744  }
  0x78   :  { %940 = vmatprep.subr.bf16.mxu0 %v6844_v11  ;;  %8829 = vst [vmem:[#allocation8_spill] sm:$0xff] %v7409_v7  ;;  %v7418_v11 = vsub.f32 %v1040_v48, %v1095_v62  ;;  %v6869_v33 = vld [vmem:[%s8725_s1 + $0x270] ss:$8 sps:$4 sm:$0xff]   ;;  %v6872_v35 = vld [vmem:[%s8725_s1 + $0x280] ss:$8 sps:$4 sm:$0xff]   ;;  %vm7015_vm5 = vmmov 0  }
  0x79   :  { %6265 = vmatpush3.bf16.msra.mxu1 %v7398_v2  ;;  %v6877_v36 = vld [vmem:[%s8725_s1 + $0x294] ss:$8 sps:$4 sm:$0xff]   ;;  %v6875_v37 = vld [vmem:[%s8725_s1 + $0x290] ss:$8 sps:$4 sm:$0xff]   ;;  %v6880_v38 = vld [vmem:[%s8725_s1 + $0x2a4] ss:$8 sps:$4 sm:$0xff]  }
  0x7a   :  { %6267 = vmatprep.subr.bf16.mxu1 %v7409_v7  ;;  %v6878_v39 = vld [vmem:[%s8725_s1 + $0x2a0] ss:$8 sps:$4 sm:$0xff]   ;;  %v6883_v40 = vld [vmem:[%s8725_s1 + $0x2b4] ss:$8 sps:$4 sm:$0xff]   ;;  %v6881_v41 = vld [vmem:[%s8725_s1 + $0x2b0] ss:$8 sps:$4 sm:$0xff]  }
  0x7b   :  { %941 = vmatpush1.bf16.msra.mxu0 %v6842_v14  ;;  %v1149_v14 = vand.u32 4294901760, %v1058_v63  ;;  %v6886_v46 = vld [vmem:[%s8725_s1 + $0x2c4] ss:$8 sps:$4 sm:$0xff]   ;;  %v6884_v47 = vld [vmem:[%s8725_s1 + $0x2c0] ss:$8 sps:$4 sm:$0xff]   ;;  %vm3299_vm6 = vcmask 58368  }
  0x7c   :  { %942 = vmatprep.subr.bf16.mxu0 %v6847_v17  ;;  %v7420_v17 = vsub.f32 %v1057_v54, %v1146_v0  ;;  %v6889_v48 = vld [vmem:[%s8725_s1 + $0x2d4] ss:$8 sps:$4 sm:$0xff]   ;;  %v70_v54 = vcombine.high %v7292_v12, %v7292_v12  ;;  %v6890_v57 = vld [vmem:[%s8725_s1 + $0x2e0] ss:$8 sps:$4 sm:$0xff]   ;;  %v6893_v12 = vld [vmem:[%s8725_s1 + $0x2f0] ss:$8 sps:$4 sm:$0xff]  }
  0x7d   :  { %v6895_v59 = vld [vmem:[%s8725_s1 + $0x2f4] ss:$8 sps:$4 sm:$0xff]   ;;  %vm3325_vm7 = vcmask 64512   ;;  %vm3906_vm8 = vcmask 523264   ;;  %vm4447_vm9 = vcmask 123904   ;;  %vm4473_vm10 = vcmask 130048  }
  0x7e   :  { %v7508_v58 = vrot.slane %v70_v54, %v7128_v16  ;;  %v99_v16 = vpack.c.bf16 %v7299_v15, %v7299_v15  ;;  %v6904_v15 = vld [vmem:[%s8725_s1 + $0x324] ss:$8 sps:$4 sm:$0xff]   ;;  %v6943_v54 = vld [vmem:[%s8725_s1 + $0x3f4] ss:$8 sps:$4 sm:$0xff]   ;;  %vm5023_vm11 = vcmask 254976   ;;  %vm5064_vm12 = vcmask 261120  }
  0x7f   :  { %943 = vmatpush1.bf16.msra.mxu0 %v6845_v18  ;;  %v1098_v18 = vand.u32 4294901760, %v1041_v1  ;;  %s6988_s24 = scalar_lea.vmem %s5205_s23, 32 }
  0x80   :  { %953 = vmatprep.subr.bf16.mxu0 %v6850_v20  ;;  %v7426_v20 = vpack.c.bf16 %v1095_v62, %v1092_v61  ;;  %v86_v60 = vcombine.high %v7508_v58, %v7508_v58  ;;  %v6898_v61 = vld [vmem:[%s8725_s1 + $0x304] ss:$8 sps:$4 sm:$0xff]   ;;  %v6896_v62 = vld [vmem:[%s8725_s1 + $0x300] ss:$8 sps:$4 sm:$0xff]   ;;  %p6989_p0 = scmp.ne.s32.totalorder %s5205_s23, %s6988_s24  ;;  %p6994_p2 = scmp.lt.s32.totalorder %s6988_s24, %s6988_s24 }
  0x82   :  { %945 = vmatmul.mubr.bf16.vlgmr.msra.gmra.mrb[0].mxu0 %v97_v21  ;;  %8830 = vst [vmem:[#allocation9_spill] sm:$0xff] %v7426_v20  ;;  %v1101_v21 = vand.u32 4294901760, %v1042_v6  ;;  %6269 = vmatpush3.bf16.msra.mxu1 %v7426_v20  ;;  %p6995_p3 = por %p6994_p2, %p6993_p1 }
  0x83   :  { %954 = vmatpush1.bf16.msra.mxu0 %v6848_v22  ;;  %985 = vmatprep.mubr.bf16.mxu0 %v100_v23  ;;  %v7429_v22 = vpack.c.bf16 %v1149_v14, %v1146_v0  ;;  %v7431_v23 = vsub.f32 %v1058_v63, %v1149_v14  ;;  %v102_v63 = vpack.c.bf16 %v86_v60, %v86_v60  ;;  %v6901_v0 = vld [vmem:[%s8725_s1 + $0x314] ss:$8 sps:$4 sm:$0xff]   ;;  %v6905_v14 = vld [vmem:[%s8725_s1 + $0x330] ss:$8 sps:$4 sm:$0xff]  }
  0x84   :  { %955 = vmatprep.subr.bf16.mxu0 %v6853_v24  ;;  %v7433_v24 = vsub.f32 %v1041_v1, %v1098_v18  ;;  %v7444_v28 = vpack.c.bf16 %v1101_v21, %v1098_v18  ;;  %v6899_v1 = vld [vmem:[%s8725_s1 + $0x310] ss:$8 sps:$4 sm:$0xff]   ;;  %v6910_v18 = vld [vmem:[%s8725_s1 + $0x344] ss:$8 sps:$4 sm:$0xff]   ;;  %p6996_p4 = pnand %p6995_p3, %p6989_p0 }
  0x85   :  { %8831 = vst [vmem:[#allocation10_spill] sm:$0xff] %v7429_v22  ;;  %6271 = vmatprep.subr.bf16.mxu1 %v7429_v22 }
  0x86   :  { %8832 = vst [vmem:[#allocation11_spill] sm:$0xff] %v7444_v28  ;;  %6273 = vmatpush3.bf16.msra.mxu1 %v7444_v28 }
  0x87   :  { %956 = vmatpush1.bf16.msra.mxu0 %v6851_v25  ;;  %v7435_v25 = vsub.f32 %v1042_v6, %v1101_v21  ;;  %v6902_v6 = vld [vmem:[%s8725_s1 + $0x320] ss:$8 sps:$4 sm:$0xff]   ;;  %v6913_v21 = vld [vmem:[%s8725_s1 + $0x354] ss:$8 sps:$4 sm:$0xff]  }
  0x88   :  { %957 = vmatprep.subr.bf16.mxu0 %v6856_v26  ;;  %v6860_v26 = vld [vmem:[%s8725_s1 + $0x240] ss:$8 sps:$4 sm:$0xff]  }
  0x8b   :  { %958 = vmatpush1.bf16.msra.mxu0 %v6854_v49  ;;  %v6887_v49 = vld [vmem:[%s8725_s1 + $0x2d0] ss:$8 sps:$4 sm:$0xff]  }
  0x8c   :  { %959 = vmatprep.subr.bf16.mxu0 %v6859_v55  ;;  %v6892_v55 = vld [vmem:[%s8725_s1 + $0x2e4] ss:$8 sps:$4 sm:$0xff]  }
  0x8f   :  { %960 = vmatpush1.bf16.msra.mxu0 %v6857_v10  ;;  %v6907_v10 = vld [vmem:[%s8725_s1 + $0x334] ss:$8 sps:$4 sm:$0xff]  }
  0x90   :  { %961 = vmatprep.subr.bf16.mxu0 %v6862_v19  ;;  %v6908_v19 = vld [vmem:[%s8725_s1 + $0x340] ss:$8 sps:$4 sm:$0xff]  }
  0x93   :  { %962 = vmatpush1.bf16.msra.mxu0 %v6860_v26  ;;  %v6911_v26 = vld [vmem:[%s8725_s1 + $0x350] ss:$8 sps:$4 sm:$0xff]  }
  0x94   :  { %963 = vmatprep.subr.bf16.mxu0 %v6865_v27  ;;  %v6916_v27 = vld [vmem:[%s8725_s1 + $0x364] ss:$8 sps:$4 sm:$0xff]  }
  0x97   :  { %964 = vmatpush1.bf16.msra.mxu0 %v6863_v29  ;;  %v6914_v29 = vld [vmem:[%s8725_s1 + $0x360] ss:$8 sps:$4 sm:$0xff]  }
  0x98   :  { %965 = vmatprep.subr.bf16.mxu0 %v6868_v30  ;;  %v6919_v30 = vld [vmem:[%s8725_s1 + $0x374] ss:$8 sps:$4 sm:$0xff]  }
  0x9b   :  { %966 = vmatpush1.bf16.msra.mxu0 %v6866_v31  ;;  %v6917_v31 = vld [vmem:[%s8725_s1 + $0x370] ss:$8 sps:$4 sm:$0xff]  }
  0x9c   :  { %967 = vmatprep.subr.bf16.mxu0 %v6871_v32  ;;  %v6922_v32 = vld [vmem:[%s8725_s1 + $0x384] ss:$8 sps:$4 sm:$0xff]  }
  0x9f   :  { %968 = vmatpush1.bf16.msra.mxu0 %v6869_v33  ;;  %v6920_v33 = vld [vmem:[%s8725_s1 + $0x380] ss:$8 sps:$4 sm:$0xff]  }
  0xa0   :  { %969 = vmatprep.subr.bf16.mxu0 %v6874_v34  ;;  %v6925_v34 = vld [vmem:[%s8725_s1 + $0x394] ss:$8 sps:$4 sm:$0xff]  }
  0xa3   :  { %970 = vmatpush1.bf16.msra.mxu0 %v6872_v35  ;;  %v6923_v35 = vld [vmem:[%s8725_s1 + $0x390] ss:$8 sps:$4 sm:$0xff]  }
  0xa4   :  { %971 = vmatprep.subr.bf16.mxu0 %v6877_v36  ;;  %v6928_v36 = vld [vmem:[%s8725_s1 + $0x3a4] ss:$8 sps:$4 sm:$0xff]  }
  0xa7   :  { %972 = vmatpush1.bf16.msra.mxu0 %v6875_v37  ;;  %v6926_v37 = vld [vmem:[%s8725_s1 + $0x3a0] ss:$8 sps:$4 sm:$0xff]  }
  0xa8   :  { %973 = vmatprep.subr.bf16.mxu0 %v6880_v38  ;;  %v6931_v38 = vld [vmem:[%s8725_s1 + $0x3b4] ss:$8 sps:$4 sm:$0xff]  }
  0xab   :  { %974 = vmatpush1.bf16.msra.mxu0 %v6878_v39  ;;  %v6929_v39 = vld [vmem:[%s8725_s1 + $0x3b0] ss:$8 sps:$4 sm:$0xff]  }
  0xac   :  { %975 = vmatprep.subr.bf16.mxu0 %v6883_v40  ;;  %v6934_v40 = vld [vmem:[%s8725_s1 + $0x3c4] ss:$8 sps:$4 sm:$0xff]  }
  0xaf   :  { %976 = vmatpush1.bf16.msra.mxu0 %v6881_v41  ;;  %v6932_v41 = vld [vmem:[%s8725_s1 + $0x3c0] ss:$8 sps:$4 sm:$0xff]  }
  0xb0   :  { %977 = vmatprep.subr.bf16.mxu0 %v6886_v46  ;;  %v6937_v46 = vld [vmem:[%s8725_s1 + $0x3d4] ss:$8 sps:$4 sm:$0xff]  }
  0xb3   :  { %978 = vmatpush1.bf16.msra.mxu0 %v6884_v47  ;;  %v6935_v47 = vld [vmem:[%s8725_s1 + $0x3d0] ss:$8 sps:$4 sm:$0xff]  }
  0xb4   :  { %979 = vmatprep.subr.bf16.mxu0 %v6889_v48  ;;  %v6940_v48 = vld [vmem:[%s8725_s1 + $0x3e4] ss:$8 sps:$4 sm:$0xff]  }
  0xb7   :  { %980 = vmatpush1.bf16.msra.mxu0 %v6887_v49  ;;  %v6938_v49 = vld [vmem:[%s8725_s1 + $0x3e0] ss:$8 sps:$4 sm:$0xff]  }
  0xb8   :  { %981 = vmatprep.subr.bf16.mxu0 %v6892_v55  ;;  %v6941_v55 = vld [vmem:[%s8725_s1 + $0x3f0] ss:$8 sps:$4 sm:$0xff]  }
  0xbb   :  { %982 = vmatpush1.bf16.msra.mxu0 %v6890_v57  ;;  %v101_v57 = vpack.c.bf16 %v7508_v58, %v7508_v58  ;;  %v1044_v58 = vld [vmem:[%s8726_s2 + $0x48] sm:$0xff] }
  0xbc   :  { %983 = vmatprep.subr.bf16.mxu0 %v6895_v59  ;;  %v1059_v59 = vld [vmem:[%s8726_s2 + $0xc0] sm:$0xff] }
  0xbd   :  { %v1152_v60 = vand.u32 4294901760, %v1059_v59 }
  0xbf   :  { %984 = vmatpush1.bf16.msra.mxu0 %v6893_v12  ;;  %v1060_v12 = vld [vmem:[%s8726_s2 + $0xc8] sm:$0xff] }
  0xc0   :  { %994 = vmatprep.subr.bf16.mxu0 %v6898_v61  ;;  %v1155_v61 = vand.u32 4294901760, %v1060_v12 }
  0xc2   :  { %986 = vmatmul.mubr.bf16.vlgmr.msra.gmra.mrb[0].mxu0 %v99_v16  ;;  %v1043_v16 = vld [vmem:[%s8726_s2 + $0x40] sm:$0xff] }
  0xc3   :  { %995 = vmatpush1.bf16.msra.mxu0 %v6896_v62  ;;  %1026 = vmatprep.mubr.bf16.mxu0 %v102_v63  ;;  %v1104_v62 = vand.u32 4294901760, %v1043_v16  ;;  %v1107_v63 = vand.u32 4294901760, %v1044_v58 }
  0xc4   :  { %996 = vmatprep.subr.bf16.mxu0 %v6901_v0  ;;  %v7630_v0 = vpack.c.bf16 %v1155_v61, %v1152_v60 }
  0xc6   :  { %8833 = vst [vmem:[#allocation12_spill] sm:$0xff] %v7630_v0  ;;  %6275 = vmatprep.subr.bf16.mxu1 %v7630_v0 }
  0xc7   :  { %997 = vmatpush1.bf16.msra.mxu0 %v6899_v1  ;;  %v7632_v1 = vpack.c.bf16 %v1107_v63, %v1104_v62 }
  0xc8   :  { %998 = vmatprep.subr.bf16.mxu0 %v6904_v15  ;;  %v1061_v15 = vld [vmem:[%s8726_s2 + $0xd0] sm:$0xff] }
  0xc9   :  { %8834 = vst [vmem:[#allocation13_spill] sm:$0xff] %v7632_v1  ;;  %6277 = vmatpush3.bf16.msra.mxu1 %v7632_v1 }
  0xcb   :  { %999 = vmatpush1.bf16.msra.mxu0 %v6902_v6  ;;  %v1062_v6 = vld [vmem:[%s8726_s2 + $0xd8] sm:$0xff] }
  0xcc   :  { %1000 = vmatprep.subr.bf16.mxu0 %v6907_v10  ;;  %v1158_v10 = vand.u32 4294901760, %v1061_v15 }
  0xcf   :  { %1001 = vmatpush1.bf16.msra.mxu0 %v6905_v14  ;;  %v1161_v14 = vand.u32 4294901760, %v1062_v6 }
  0xd0   :  { %1002 = vmatprep.subr.bf16.mxu0 %v6910_v18  ;;  %v1045_v18 = vld [vmem:[%s8726_s2 + $0x50] sm:$0xff] }
  0xd3   :  { %1003 = vmatpush1.bf16.msra.mxu0 %v6908_v19  ;;  %v1046_v19 = vld [vmem:[%s8726_s2 + $0x58] sm:$0xff] }
  0xd4   :  { %1004 = vmatprep.subr.bf16.mxu0 %v6913_v21  ;;  %v1110_v21 = vand.u32 4294901760, %v1045_v18 }
  0xd7   :  { %1005 = vmatpush1.bf16.msra.mxu0 %v6911_v26  ;;  %v1113_v26 = vand.u32 4294901760, %v1046_v19 }
  0xd8   :  { %1006 = vmatprep.subr.bf16.mxu0 %v6916_v27  ;;  %v7648_v27 = vpack.c.bf16 %v1161_v14, %v1158_v10 }
  0xda   :  { %8835 = vst [vmem:[#allocation14_spill] sm:$0xff] %v7648_v27  ;;  %6279 = vmatprep.subr.bf16.mxu1 %v7648_v27 }
  0xdb   :  { %1007 = vmatpush1.bf16.msra.mxu0 %v6914_v29  ;;  %v7650_v29 = vpack.c.bf16 %v1113_v26, %v1110_v21 }
  0xdc   :  { %1008 = vmatprep.subr.bf16.mxu0 %v6919_v30  ;;  %v1063_v30 = vld [vmem:[%s8726_s2 + $0xe0] sm:$0xff] }
  0xdd   :  { %8836 = vst [vmem:[#allocation15_spill] sm:$0xff] %v7650_v29  ;;  %6281 = vmatpush3.bf16.msra.mxu1 %v7650_v29 }
  0xdf   :  { %1009 = vmatpush1.bf16.msra.mxu0 %v6917_v31  ;;  %v1064_v31 = vld [vmem:[%s8726_s2 + $0xe8] sm:$0xff] }
  0xe0   :  { %1010 = vmatprep.subr.bf16.mxu0 %v6922_v32  ;;  %v1164_v32 = vand.u32 4294901760, %v1063_v30 }
  0xe3   :  { %1011 = vmatpush1.bf16.msra.mxu0 %v6920_v33  ;;  %v1167_v33 = vand.u32 4294901760, %v1064_v31 }
  0xe4   :  { %1012 = vmatprep.subr.bf16.mxu0 %v6925_v34  ;;  %v1047_v34 = vld [vmem:[%s8726_s2 + $0x60] sm:$0xff] }
  0xe7   :  { %1013 = vmatpush1.bf16.msra.mxu0 %v6923_v35  ;;  %v1048_v35 = vld [vmem:[%s8726_s2 + $0x68] sm:$0xff] }
  0xe8   :  { %1014 = vmatprep.subr.bf16.mxu0 %v6928_v36  ;;  %v1116_v36 = vand.u32 4294901760, %v1047_v34 }
  0xeb   :  { %1015 = vmatpush1.bf16.msra.mxu0 %v6926_v37  ;;  %v1119_v37 = vand.u32 4294901760, %v1048_v35 }
  0xec   :  { %1016 = vmatprep.subr.bf16.mxu0 %v6931_v38  ;;  %v7666_v38 = vpack.c.bf16 %v1167_v33, %v1164_v32 }
  0xee   :  { %8837 = vst [vmem:[#allocation16_spill] sm:$0xff] %v7666_v38  ;;  %6283 = vmatprep.subr.bf16.mxu1 %v7666_v38 }
  0xef   :  { %1017 = vmatpush1.bf16.msra.mxu0 %v6929_v39  ;;  %v7668_v39 = vpack.c.bf16 %v1119_v37, %v1116_v36 }
  0xf0   :  { %1018 = vmatprep.subr.bf16.mxu0 %v6934_v40  ;;  %v1065_v40 = vld [vmem:[%s8726_s2 + $0xf0] sm:$0xff] }
  0xf1   :  { %8838 = vst [vmem:[#allocation17_spill] sm:$0xff] %v7668_v39  ;;  %6285 = vmatpush3.bf16.msra.mxu1 %v7668_v39 }
  0xf3   :  { %1019 = vmatpush1.bf16.msra.mxu0 %v6932_v41  ;;  %v7673_v41 = vsub.f32 %v1059_v59, %v1152_v60  ;;  %v7693_v59 = vsub.f32 %v1062_v6, %v1161_v14  ;;  %v7697_v60 = vsub.f32 %v1046_v19, %v1113_v26  ;;  %v8744_v6 = vand.u32 4294901760, %v7355_v43 }
  0xf4   :  { %1020 = vmatprep.subr.bf16.mxu0 %v6937_v46  ;;  %v7675_v46 = vsub.f32 %v1060_v12, %v1155_v61  ;;  %v7695_v12 = vsub.f32 %v1045_v18, %v1110_v21  ;;  %v7700_v61 = vsub.f32 %v1063_v30, %v1164_v32  ;;  %v8743_v14 = vand.u32 4294901760, %v7357_v44 }
  0xf5   :  { %8839 = vst [vmem:[#allocation18_spill] sm:$0xff] %v7673_v41  ;;  %8843 = vst [vmem:[#allocation22_spill] sm:$0xff] %v7693_v59  ;;  %v8741_v18 = vand.u32 4294901760, %v7359_v45  ;;  %v8742_v19 = vand.u32 4294901760, %v7375_v51 }
  0xf6   :  { %8840 = vst [vmem:[#allocation19_spill] sm:$0xff] %v7675_v46  ;;  %8844 = vst [vmem:[#allocation23_spill] sm:$0xff] %v7695_v12  ;;  %v8770_v38 = vand.u32 4294901760, %v7675_v46 }
  0xf7   :  { %1021 = vmatpush1.bf16.msra.mxu0 %v6935_v47  ;;  %v7677_v47 = vsub.f32 %v1043_v16, %v1104_v62  ;;  %8845 = vst [vmem:[#allocation24_spill] sm:$0xff] %v7697_v60  ;;  %8846 = vst [vmem:[#allocation25_spill] sm:$0xff] %v7700_v61  ;;  %v7702_v16 = vsub.f32 %v1064_v31, %v1167_v33  ;;  %v7706_v62 = vsub.f32 %v1048_v35, %v1119_v37 }
  0xf8   :  { %1022 = vmatprep.subr.bf16.mxu0 %v6940_v48  ;;  %v7679_v48 = vsub.f32 %v1044_v58, %v1107_v63  ;;  %v7704_v58 = vsub.f32 %v1047_v34, %v1116_v36  ;;  %v1170_v63 = vand.u32 4294901760, %v1065_v40  ;;  %v1307_v34 = vsub.f32 %v7355_v43, %v8744_v6 }
  0xf9   :  { %8847 = vst [vmem:[#allocation26_spill] sm:$0xff] %v7702_v16  ;;  %8849 = vst [vmem:[#allocation28_spill] sm:$0xff] %v7706_v62  ;;  %v1314_v35 = vsub.f32 %v7357_v44, %v8743_v14  ;;  %v1202_v36 = vsub.f32 %v7375_v51, %v8742_v19  ;;  %v8747_v37 = vand.u32 4294901760, %v7379_v53 }
  0xfa   :  { %8841 = vst [vmem:[#allocation20_spill] sm:$0xff] %v7679_v48  ;;  %8848 = vst [vmem:[#allocation27_spill] sm:$0xff] %v7704_v58  ;;  %v7714_v26 = vsub.f32 %v1065_v40, %v1170_v63  ;;  %v8750_v40 = vand.u32 4294901760, %v7388_v56 }
  0xfb   :  { %1023 = vmatpush1.bf16.msra.mxu0 %v6938_v49  ;;  %v1066_v49 = vld [vmem:[%s8726_s2 + $0xf8] sm:$0xff] }
  0xfc   :  { %1024 = vmatprep.subr.bf16.mxu0 %v6943_v54  ;;  %v1049_v54 = vld [vmem:[%s8726_s2 + $0x70] sm:$0xff]  ;;  %v1173_v13 = vand.u32 4294901760, %v1066_v49  ;;  %8851 = vst [vmem:[#allocation30_spill] sm:$0xff] %v7714_v26  ;;  %v1328_v19 = vsub.f32 %v7388_v56, %v8750_v40 }
  0xfe   :  { %v7712_v21 = vpack.c.bf16 %v1173_v13, %v1170_v63  ;;  %v7716_v30 = vsub.f32 %v1066_v49, %v1173_v13  ;;  %v1195_v13 = vsub.f32 %v7359_v45, %v8741_v18  ;;  %v1308_v49 = vand.u32 4294901760, %v1307_v34 }
  0xff   :  { %1025 = vmatpush1.bf16.msra.mxu0 %v6941_v55  ;;  %v1050_v55 = vld [vmem:[%s8726_s2 + $0x78] sm:$0xff]  ;;  %v8755_v63 = vand.u32 4294901760, %v7402_v4  ;;  %v1321_v18 = vsub.f32 %v7379_v53, %v8747_v37  ;;  %v8753_v37 = vand.u32 4294901760, %v7411_v8 }
 0x100   :  { %8850 = vst [vmem:[#allocation29_spill] sm:$0xff] %v7712_v21  ;;  %8852 = vst [vmem:[#allocation31_spill] sm:$0xff] %v7716_v30  ;;  %6287 = vmatprep.subr.bf16.mxu1 %v7712_v21 }
 0x101   :  { %v1322_v6 = vand.u32 4294901760, %v1321_v18  ;;  %v8756_v18 = vand.u32 4294901760, %v7418_v11 }
 0x102   :  { %1027 = vmatmul.mubr.bf16.vlgmr.msra.gmra.mrb[0].mxu0 %v101_v57  ;;  %v7691_v57 = vsub.f32 %v1061_v15, %v1158_v10  ;;  %v1122_v15 = vand.u32 4294901760, %v1049_v54  ;;  %v1125_v10 = vand.u32 4294901760, %v1050_v55 }
 0x104   :  { %8842 = vst [vmem:[#allocation21_spill] sm:$0xff] %v7691_v57  ;;  %v7718_v31 = vpack.c.bf16 %v1125_v10, %v1122_v15  ;;  %v7720_v32 = vsub.f32 %v1049_v54, %v1122_v15  ;;  %v7722_v33 = vsub.f32 %v1050_v55, %v1125_v10  ;;  %v1315_v54 = vand.u32 4294901760, %v1314_v35 }
 0x105   :  { %v8751_v55 = vand.u32 4294901760, %v7400_v3  ;;  %v1196_v15 = vand.u32 4294901760, %v1195_v13  ;;  %v1203_v10 = vand.u32 4294901760, %v1202_v36  ;;  %v1216_v35 = vsub.f32 %v7402_v4, %v8755_v63 }
 0x106   :  { %8853 = vst [vmem:[#allocation32_spill] sm:$0xff] %v7718_v31  ;;  %8854 = vst [vmem:[#allocation33_spill] sm:$0xff] %v7720_v32  ;;  %6289 = vmatpush3.bf16.msra.mxu1 %v7718_v31  ;;  %v6290_v14 = vpack.c.bf16 %v1315_v54, %v1308_v49  ;;  %v8752_v13 = vand.u32 4294901760, %v7404_v5  ;;  %v1329_v31 = vand.u32 4294901760, %v1328_v19  ;;  %v8754_v54 = vand.u32 4294901760, %v7413_v9 }
 0x107   :  { %8855 = vst [vmem:[#allocation34_spill] sm:$0xff] %v7722_v33  ;;  %v1209_v34 = vsub.f32 %v7400_v3, %v8751_v55  ;;  %v7755_v36 = vpack.c.bf16 %v1203_v10, %v1196_v15  ;;  %v1217_v40 = vand.u32 4294901760, %v1216_v35  ;;  %v1342_v15 = vsub.f32 %v7411_v8, %v8753_v37 }
 0x108   :  { %6291 = vmatprep.subr.bf16.mxu1 %v6290_v14  ;;  %v1335_v49 = vsub.f32 %v7404_v5, %v8752_v13  ;;  %v7762_v55 = vpack.c.bf16 %v1329_v31, %v1322_v6  ;;  %v8759_v19 = vand.u32 4294901760, %v7420_v17  ;;  %v8762_v35 = vand.u32 4294901760, %v7431_v23 }
 0x109   :  { %v1210_v21 = vand.u32 4294901760, %v1209_v34  ;;  %v1223_v34 = vsub.f32 %v7413_v9, %v8754_v54  ;;  %v1343_v13 = vand.u32 4294901760, %v1342_v15  ;;  %v1230_v6 = vsub.f32 %v7418_v11, %v8756_v18 }
 0x10a   :  { %v1336_v14 = vand.u32 4294901760, %v1335_v49  ;;  %v1349_v31 = vsub.f32 %v7420_v17, %v8759_v19  ;;  %v8767_v37 = vand.u32 4294901760, %v7433_v24  ;;  %v8765_v49 = vand.u32 4294901760, %v7435_v25 }
 0x10b   :  { %v7769_v10 = vpack.c.bf16 %v1217_v40, %v1210_v21  ;;  %v1224_v21 = vand.u32 4294901760, %v1223_v34  ;;  %v1356_v40 = vsub.f32 %v7431_v23, %v8762_v35  ;;  %v1231_v15 = vand.u32 4294901760, %v1230_v6 }
 0x10c   :  { %v7786_v54 = vpack.c.bf16 %v1343_v13, %v1336_v14  ;;  %v1350_v63 = vand.u32 4294901760, %v1349_v31  ;;  %v1237_v18 = vsub.f32 %v7433_v24, %v8767_v37  ;;  %v1244_v19 = vsub.f32 %v7435_v25, %v8765_v49 }
 0x10d   :  { %v1357_v39 = vand.u32 4294901760, %v1356_v40  ;;  %v8766_v34 = vand.u32 4294901760, %v7673_v41  ;;  %v7796_v35 = vpack.c.bf16 %v1231_v15, %v1224_v21  ;;  %v8771_v13 = vand.u32 4294901760, %v7677_v47 }
 0x10e   :  { %v1238_v29 = vand.u32 4294901760, %v1237_v18  ;;  %v8772_v14 = vand.u32 4294901760, %v7679_v48  ;;  %v1245_v31 = vand.u32 4294901760, %v1244_v19  ;;  %v1370_v49 = vsub.f32 %v7675_v46, %v8770_v38 }
 0x10f   :  { %v7800_v6 = vpack.c.bf16 %v1357_v39, %v1350_v63  ;;  %v1363_v40 = vsub.f32 %v7673_v41, %v8766_v34  ;;  %v1251_v21 = vsub.f32 %v7677_v47, %v8771_v13  ;;  %v8777_v39 = vand.u32 4294901760, %v7691_v57 }
 0x110   :  { %v1258_v18 = vsub.f32 %v7679_v48, %v8772_v14  ;;  %v8778_v63 = vand.u32 4294901760, %v7693_v59  ;;  %v7816_v19 = vpack.c.bf16 %v1245_v31, %v1238_v29  ;;  %v1371_v34 = vand.u32 4294901760, %v1370_v49 }
 0x111   :  { %v1364_v15 = vand.u32 4294901760, %v1363_v40  ;;  %v8781_v37 = vand.u32 4294901760, %v7695_v12  ;;  %v1252_v27 = vand.u32 4294901760, %v1251_v21  ;;  %v1377_v13 = vsub.f32 %v7691_v57, %v8777_v39 }
 0x112   :  { %v1259_v38 = vand.u32 4294901760, %v1258_v18  ;;  %v1384_v14 = vsub.f32 %v7693_v59, %v8778_v63  ;;  %v8779_v49 = vand.u32 4294901760, %v7697_v60  ;;  %v8780_v18 = vand.u32 4294901760, %v7700_v61 }
 0x113   :  { %v7825_v1 = vpack.c.bf16 %v1371_v34, %v1364_v15  ;;  %v1265_v29 = vsub.f32 %v7695_v12, %v8781_v37  ;;  %v1378_v40 = vand.u32 4294901760, %v1377_v13  ;;  %v8786_v34 = vand.u32 4294901760, %v7702_v16 }
 0x114   :  { %v7831_v31 = vpack.c.bf16 %v1259_v38, %v1252_v27  ;;  %v1385_v21 = vand.u32 4294901760, %v1384_v14  ;;  %v1272_v39 = vsub.f32 %v7697_v60, %v8779_v49  ;;  %v8787_v15 = vand.u32 4294901760, %v7704_v58 }
 0x115   :  { %v1266_v0 = vand.u32 4294901760, %v1265_v29  ;;  %v1391_v27 = vsub.f32 %v7700_v61, %v8780_v18  ;;  %v8788_v38 = vand.u32 4294901760, %v7706_v62  ;;  %v1398_v14 = vsub.f32 %v7702_v16, %v8786_v34 }
 0x116   :  { %v7839_v63 = vpack.c.bf16 %v1385_v21, %v1378_v40  ;;  %v1273_v13 = vand.u32 4294901760, %v1272_v39  ;;  %v1279_v29 = vsub.f32 %v7704_v58, %v8787_v15  ;;  %v8793_v21 = vand.u32 4294901760, %v7714_v26 }
 0x117   :  { %v1392_v49 = vand.u32 4294901760, %v1391_v27  ;;  %v1286_v40 = vsub.f32 %v7706_v62, %v8788_v38  ;;  %v8798_v18 = vand.u32 4294901760, %v7716_v30  ;;  %v1399_v39 = vand.u32 4294901760, %v1398_v14 }
 0x118   :  { %v7856_v37 = vpack.c.bf16 %v1273_v13, %v1266_v0  ;;  %v1280_v28 = vand.u32 4294901760, %v1279_v29  ;;  %v8800_v22 = vand.u32 4294901760, %v7720_v32  ;;  %v1405_v15 = vsub.f32 %v7714_v26, %v8793_v21 }
 0x119   :  { %v1287_v34 = vand.u32 4294901760, %v1286_v40  ;;  %v1412_v27 = vsub.f32 %v7716_v30, %v8798_v18  ;;  %v8799_v38 = vand.u32 4294901760, %v7722_v33  ;;  %v6314_v20 = vpack.c.bf16 %v1399_v39, %v1392_v49 }
 0x11a   :  { %v1293_v0 = vsub.f32 %v7720_v32, %v8800_v22  ;;  %v1406_v14 = vand.u32 4294901760, %v1405_v15  ;;  %v6322_v18 = vpack.c.bf16 %v7357_v44, %v7355_v43  ;;  %v6324_v49 = vpack.c.bf16 %v7375_v51, %v7359_v45 }
 0x11b   :  { %v6316_v13 = vpack.c.bf16 %v1287_v34, %v1280_v28  ;;  %v1413_v29 = vand.u32 4294901760, %v1412_v27  ;;  %v1300_v40 = vsub.f32 %v7722_v33, %v8799_v38  ;;  %v6326_v39 = vpack.c.bf16 %v7388_v56, %v7379_v53 }
 0x11c   :  { %v1294_v7 = vand.u32 4294901760, %v1293_v0  ;;  %v6328_v28 = vpack.c.bf16 %v7402_v4, %v7400_v3  ;;  %v6330_v34 = vpack.c.bf16 %v7411_v8, %v7404_v5  ;;  %v6332_v15 = vpack.c.bf16 %v7418_v11, %v7413_v9 }
 0x11d   :  { %v6318_v21 = vpack.c.bf16 %v1413_v29, %v1406_v14  ;;  %v1301_v2 = vand.u32 4294901760, %v1300_v40  ;;  %v6338_v27 = vpack.c.bf16 %v7675_v46, %v7673_v41  ;;  %v6340_v0 = vpack.c.bf16 %v7679_v48, %v7677_v47 }
 0x11e   :  { %v6342_v14 = vpack.c.bf16 %v7693_v59, %v7691_v57  ;;  %v6344_v29 = vpack.c.bf16 %v7697_v60, %v7695_v12  ;;  %v6346_v40 = vpack.c.bf16 %v7702_v16, %v7700_v61  ;;  %v6348_v38 = vpack.c.bf16 %v7706_v62, %v7704_v58 }
 0x11f   :  { %v6320_v52 = vpack.c.bf16 %v1301_v2, %v1294_v7  ;;  %v6334_v2 = vpack.c.bf16 %v7431_v23, %v7420_v17  ;;  %v6336_v7 = vpack.c.bf16 %v7435_v25, %v7433_v24  ;;  %v6350_v22 = vpack.c.bf16 %v7716_v30, %v7714_v26 }
 0x120   :  { %v6352_v46 = vpack.c.bf16 %v7722_v33, %v7720_v32 }
 0x1d5   :  { %v7904_v41 = vpop.f32.mrb[0].mxu0 }
 0x1d6   :  { %8856 = vst [vmem:[#allocation35_spill] sm:$0xff] %v7904_v41  ;;  %v1068_v59 = vmul.f32 %v7904_v41, %v7904_v41  ;;  %v7908_v57 = vpop.f32.mrb[1].mxu0 }
 0x1d7   :  { %v1069_v16 = vmul.f32 %v7908_v57, %v7908_v57  ;;  %v1032_v61 = vpop.f32.mrb[2].mxu0 }
 0x1d8   :  { %v1072_v60 = vrot.slane %v1068_v59, 6  ;;  %v1033_v62 = vpop.f32.mrb[3].mxu0 }
 0x1d9   :  { %v1073_v58 = vrot.slane %v1069_v16, 6 }
 0x1da   :  { %v1077_v30 = vsel %vm1076_vm0, %v7904_v41, %v1072_v60 }
 0x1db   :  { %v7914_v26 = vand.u32 4294901760, %v1077_v30  ;;  %v1078_v33 = vsel %vm1076_vm0, %v7908_v57, %v1073_v58  ;;  %v8862_v58 = vld [vmem:[#allocation11_spill] sm:$0xff] }
 0x1dc   :  { %v7918_v32 = vand.u32 4294901760, %v1078_v33 }
 0x1dd   :  { %v7921_v12 = vsub.f32 %v1077_v30, %v7914_v26  ;;  %v8865_v30 = vld [vmem:[#allocation14_spill] sm:$0xff] }
 0x1de   :  { %v1176_v48 = vsub.f32 %v1078_v33, %v7918_v32  ;;  %v8866_v33 = vld [vmem:[#allocation15_spill] sm:$0xff] }
 0x1df   :  { %v1183_v61 = vand.u32 4294901760, %v7921_v12 }
 0x1e0   :  { %v1177_v59 = vand.u32 4294901760, %v1176_v48 }
 0x1e1   :  { %v1184_v16 = vsub.f32 %v7921_v12, %v1183_v61 }
 0x1e2   :  { %v1178_v60 = vsub.f32 %v1176_v48, %v1177_v59 }
 0x1e3   :  { %v1185_v41 = vand.u32 4294901760, %v1184_v16 }
 0x1e4   :  { %v1179_v62 = vand.u32 4294901760, %v1178_v60 }
 0x1e6   :  { %1180 = vmatprep.mubr.f32.mxu1 %v1179_v62  ;;  %v8902_v62 = vld [vmem:[#allocation25_spill] sm:$0xff] }
 0x1e7   :  { %1186 = vmatmul.mubr.f32.vlgmr.msra.gmra.mrb[0].mxu1 %v1185_v41  ;;  %v8860_v41 = vld [vmem:[#allocation9_spill] sm:$0xff] }
 0x1e8   :  { %6293 = vmatpush3.bf16.msra.mxu1 %v7755_v36  ;;  %1416 = vmatprep.mubr.f32.mxu1 %v7918_v32  ;;  %v8869_v36 = vld [vmem:[#allocation29_spill] sm:$0xff] }
 0x1e9   :  { %6295 = vmatprep.subr.bf16.mxu1 %v7762_v55  ;;  %v8868_v55 = vld [vmem:[#allocation17_spill] sm:$0xff] }
 0x1ec   :  { %6297 = vmatpush3.bf16.msra.mxu1 %v7769_v10  ;;  %v8871_v10 = vand.u32 4294901760, %v7357_v44  ;;  %v8878_v44 = vand.u32 4294901760, %v7402_v4  ;;  %v8885_v4 = vand.u32 4294901760, %v7433_v24 }
 0x1ed   :  { %6299 = vmatprep.subr.bf16.mxu1 %v7786_v54  ;;  %v8870_v54 = vand.u32 4294901760, %v7355_v43  ;;  %v8877_v43 = vand.u32 4294901760, %v7400_v3  ;;  %v8884_v3 = vand.u32 4294901760, %v7431_v23  ;;  %v8894_v23 = vld [vmem:[#allocation21_spill] sm:$0xff] }
 0x1f0   :  { %6301 = vmatpush3.bf16.msra.mxu1 %v7796_v35  ;;  %v6386_v35 = vpack.c.bf16 %v8871_v10, %v8870_v54  ;;  %v8903_v54 = vand.u32 4294901760, %v8902_v62  ;;  %v8904_v10 = vld [vmem:[#allocation26_spill] sm:$0xff] }
 0x1f1   :  { %6303 = vmatprep.subr.bf16.mxu1 %v7800_v6  ;;  %v8872_v6 = vld [vmem:[#allocation32_spill] sm:$0xff] }
 0x1f4   :  { %6305 = vmatpush3.bf16.msra.mxu1 %v7816_v19  ;;  %v8874_v19 = vand.u32 4294901760, %v7375_v51  ;;  %v8879_v51 = vand.u32 4294901760, %v7404_v5  ;;  %v8886_v5 = vand.u32 4294901760, %v7435_v25  ;;  %v8898_v25 = vld [vmem:[#allocation23_spill] sm:$0xff] }
 0x1f5   :  { %6307 = vmatprep.subr.bf16.mxu1 %v7825_v1  ;;  %v8859_v1 = vld [vmem:[#allocation8_spill] sm:$0xff] }
 0x1f8   :  { %6309 = vmatpush3.bf16.msra.mxu1 %v7831_v31 }
 0x1f9   :  { %6311 = vmatprep.subr.bf16.mxu1 %v7839_v63  ;;  %v8873_v63 = vand.u32 4294901760, %v7359_v45  ;;  %v6392_v45 = vpack.c.bf16 %v8878_v44, %v8877_v43  ;;  %v8912_v44 = vld [vmem:[#allocation31_spill] sm:$0xff] }
 0x1fb   :  { %v6388_v31 = vpack.c.bf16 %v8874_v19, %v8873_v63  ;;  %v8906_v63 = vld [vmem:[#allocation27_spill] sm:$0xff] }
 0x1fc   :  { %6313 = vmatpush3.bf16.msra.mxu1 %v7856_v37  ;;  %v8867_v37 = vld [vmem:[#allocation16_spill] sm:$0xff]  ;;  %v8907_v19 = vand.u32 4294901760, %v8906_v63 }
 0x1fd   :  { %6315 = vmatprep.subr.bf16.mxu1 %v6314_v20  ;;  %v8858_v20 = vld [vmem:[#allocation7_spill] sm:$0xff] }
 0x200   :  { %6317 = vmatpush3.bf16.msra.mxu1 %v6316_v13  ;;  %v8880_v13 = vand.u32 4294901760, %v7411_v8  ;;  %v8887_v8 = vld [vmem:[#allocation18_spill] sm:$0xff] }
 0x201   :  { %6319 = vmatprep.subr.bf16.mxu1 %v6318_v21 }
 0x204   :  { %6321 = vmatpush3.bf16.msra.mxu1 %v6320_v52  ;;  %v8857_v52 = vld [vmem:[#allocation6_spill] sm:$0xff] }
 0x205   :  { %6323 = vmatprep.subr.bf16.mxu1 %v6322_v18  ;;  %v8875_v18 = vand.u32 4294901760, %v7379_v53  ;;  %v6394_v53 = vpack.c.bf16 %v8880_v13, %v8879_v51  ;;  %v8914_v13 = vld [vmem:[#allocation33_spill] sm:$0xff] }
 0x207   :  { %1418 = vmatmul.mubr.f32.vlgmr.msra.gmra.mrb[2].mxu1 %v7914_v26 }
 0x208   :  { %6325 = vmatpush3.bf16.msra.mxu1 %v6324_v49  ;;  %1553 = vmatprep.mubr.f32.mxu1 %v1176_v48  ;;  %v8861_v48 = vld [vmem:[#allocation10_spill] sm:$0xff] }
 0x209   :  { %6327 = vmatprep.subr.bf16.mxu1 %v6326_v39  ;;  %v8883_v39 = vand.u32 4294901760, %v7420_v17 }
 0x20c   :  { %6329 = vmatpush3.bf16.msra.mxu1 %v6328_v28  ;;  %v6398_v28 = vpack.c.bf16 %v8884_v3, %v8883_v39 }
 0x20d   :  { %6331 = vmatprep.subr.bf16.mxu1 %v6330_v34  ;;  %v6400_v34 = vpack.c.bf16 %v8886_v5, %v8885_v4 }
 0x210   :  { %6333 = vmatpush3.bf16.msra.mxu1 %v6332_v15  ;;  %v8888_v15 = vand.u32 4294901760, %v8887_v8 }
 0x211   :  { %6335 = vmatprep.subr.bf16.mxu1 %v6334_v2  ;;  %v8889_v2 = vld [vmem:[#allocation19_spill] sm:$0xff] }
 0x214   :  { %6337 = vmatpush3.bf16.msra.mxu1 %v6336_v7 }
 0x215   :  { %6339 = vmatprep.subr.bf16.mxu1 %v6338_v27  ;;  %v8892_v27 = vld [vmem:[#allocation20_spill] sm:$0xff] }
 0x216   :  { %v8893_v17 = vand.u32 4294901760, %v8892_v27 }
 0x218   :  { %6341 = vmatpush3.bf16.msra.mxu1 %v6340_v0 }
 0x219   :  { %6343 = vmatprep.subr.bf16.mxu1 %v6342_v14  ;;  %v8895_v14 = vand.u32 4294901760, %v8894_v23 }
 0x21c   :  { %6345 = vmatpush3.bf16.msra.mxu1 %v6344_v29  ;;  %v8896_v29 = vld [vmem:[#allocation22_spill] sm:$0xff] }
 0x21d   :  { %6347 = vmatprep.subr.bf16.mxu1 %v6346_v40  ;;  %v8897_v24 = vand.u32 4294901760, %v8896_v29 }
 0x21f   :  { %v6406_v40 = vpack.c.bf16 %v8897_v24, %v8895_v14 }
 0x220   :  { %6349 = vmatpush3.bf16.msra.mxu1 %v6348_v38  ;;  %v8876_v38 = vand.u32 4294901760, %v7388_v56  ;;  %v8881_v56 = vand.u32 4294901760, %v7413_v9  ;;  %v8890_v9 = vand.u32 4294901760, %v8889_v2 }
 0x221   :  { %6351 = vmatprep.subr.bf16.mxu1 %v6350_v22  ;;  %v8863_v22 = vld [vmem:[#allocation12_spill] sm:$0xff] }
 0x222   :  { %v6390_v21 = vpack.c.bf16 %v8876_v38, %v8875_v18  ;;  %v6402_v7 = vpack.c.bf16 %v8890_v9, %v8888_v15 }
 0x224   :  { %6353 = vmatpush3.bf16.msra.mxu1 %v6352_v46  ;;  %v8864_v46 = vld [vmem:[#allocation13_spill] sm:$0xff] }
 0x225   :  { %6355 = vmatprep.subr.bf16.mxu1 %v7353_v42 }
 0x227   :  { %1556 = vmatmul.mubr.f32.vlgmr.msra.gmra.mrb[4].mxu1 %v7921_v12  ;;  %v8882_v12 = vand.u32 4294901760, %v7418_v11  ;;  %v8891_v11 = vand.u32 4294901760, %v7677_v47  ;;  %v8905_v47 = vand.u32 4294901760, %v8904_v10 }
 0x228   :  { %6357 = vmatpush3.bf16.msra.mxu1 %v7373_v50  ;;  %1660 = vmatprep.mubr.f32.mxu1 %v1177_v59  ;;  %v8900_v59 = vld [vmem:[#allocation24_spill] sm:$0xff] }
 0x229   :  { %6359 = vmatprep.subr.bf16.mxu1 %v8857_v52  ;;  %v6396_v49 = vpack.c.bf16 %v8882_v12, %v8881_v56  ;;  %v6404_v0 = vpack.c.bf16 %v8893_v17, %v8891_v11  ;;  %v8901_v16 = vand.u32 4294901760, %v8900_v59  ;;  %v8916_v56 = vld [vmem:[#allocation34_spill] sm:$0xff] }
 0x22a   :  { %v8917_v12 = vand.u32 4294901760, %v8916_v56 }
 0x22c   :  { %6361 = vmatpush3.bf16.msra.mxu1 %v8858_v20 }
 0x22d   :  { %6363 = vmatprep.subr.bf16.mxu1 %v8859_v1 }
 0x230   :  { %6365 = vmatpush3.bf16.msra.mxu1 %v8860_v41 }
 0x231   :  { %6367 = vmatprep.subr.bf16.mxu1 %v8861_v48 }
 0x234   :  { %6369 = vmatpush3.bf16.msra.mxu1 %v8862_v58 }
 0x235   :  { %6371 = vmatprep.subr.bf16.mxu1 %v8863_v22 }
 0x238   :  { %6373 = vmatpush3.bf16.msra.mxu1 %v8864_v46 }
 0x239   :  { %6375 = vmatprep.subr.bf16.mxu1 %v8865_v30 }
 0x23c   :  { %6377 = vmatpush3.bf16.msra.mxu1 %v8866_v33 }
 0x23d   :  { %6379 = vmatprep.subr.bf16.mxu1 %v8867_v37 }
 0x240   :  { %6381 = vmatpush3.bf16.msra.mxu1 %v8868_v55 }
 0x241   :  { %6383 = vmatprep.subr.bf16.mxu1 %v8869_v36 }
 0x244   :  { %6385 = vmatpush3.bf16.msra.mxu1 %v8872_v6 }
 0x245   :  { %6387 = vmatprep.subr.bf16.mxu1 %v6386_v35  ;;  %v6410_v35 = vpack.c.bf16 %v8905_v47, %v8903_v54 }
 0x247   :  { %1664 = vmatmul.mubr.f32.vlgmr.msra.gmra.mrb[6].mxu1 %v1183_v61  ;;  %v8899_v61 = vand.u32 4294901760, %v8898_v25 }
 0x248   :  { %6389 = vmatpush3.bf16.msra.mxu1 %v6388_v31  ;;  %1830 = vmatprep.mubr.f32.mxu1 %v7918_v32  ;;  %v8908_v31 = vld [vmem:[#allocation28_spill] sm:$0xff] }
 0x249   :  { %6391 = vmatprep.subr.bf16.mxu1 %v6390_v21  ;;  %v6408_v60 = vpack.c.bf16 %v8901_v16, %v8899_v61  ;;  %v8909_v18 = vand.u32 4294901760, %v8908_v31  ;;  %v8910_v21 = vld [vmem:[#allocation30_spill] sm:$0xff] }
 0x24a   :  { %v8911_v43 = vand.u32 4294901760, %v8910_v21 }
 0x24b   :  { %v6412_v38 = vpack.c.bf16 %v8909_v18, %v8907_v19 }
 0x24c   :  { %6393 = vmatpush3.bf16.msra.mxu1 %v6392_v45  ;;  %v8913_v45 = vand.u32 4294901760, %v8912_v44 }
 0x24d   :  { %6395 = vmatprep.subr.bf16.mxu1 %v6394_v53  ;;  %v8915_v53 = vand.u32 4294901760, %v8914_v13 }
 0x24e   :  { %v6414_v51 = vpack.c.bf16 %v8913_v45, %v8911_v43 }
 0x250   :  { %6397 = vmatpush3.bf16.msra.mxu1 %v6396_v49  ;;  %v6416_v49 = vpack.c.bf16 %v8917_v12, %v8915_v53 }
 0x251   :  { %6399 = vmatprep.subr.bf16.mxu1 %v6398_v28 }
 0x254   :  { %6401 = vmatpush3.bf16.msra.mxu1 %v6400_v34 }
 0x255   :  { %6403 = vmatprep.subr.bf16.mxu1 %v6402_v7 }
 0x258   :  { %6405 = vmatpush3.bf16.msra.mxu1 %v6404_v0 }
 0x259   :  { %6407 = vmatprep.subr.bf16.mxu1 %v6406_v40 }
 0x25c   :  { %6409 = vmatpush3.bf16.msra.mxu1 %v6408_v60 }
 0x25d   :  { %6411 = vmatprep.subr.bf16.mxu1 %v6410_v35 }
 0x260   :  { %6413 = vmatpush3.bf16.msra.mxu1 %v6412_v38 }
 0x261   :  { %6415 = vmatprep.subr.bf16.mxu1 %v6414_v51 }
 0x264   :  { %6417 = vmatpush3.bf16.msra.mxu1 %v6416_v49 }
 0x265   :  { %6419 = vmatprep.subr.bf16.mxu1 %v7353_v42 }
 0x267   :  { %1832 = vmatmul.mubr.f32.vlgmr.msra.gmra.mrb[8].mxu1 %v7914_v26 }
 0x268   :  { %6421 = vmatpush3.bf16.msra.mxu1 %v7373_v50  ;;  %1934 = vmatprep.mubr.f32.mxu1 %v7918_v32 }
 0x269   :  { %6423 = vmatprep.subr.bf16.mxu1 %v8857_v52 }
 0x26c   :  { %6425 = vmatpush3.bf16.msra.mxu1 %v8858_v20 }
 0x26d   :  { %6427 = vmatprep.subr.bf16.mxu1 %v8859_v1 }
 0x270   :  { %6429 = vmatpush3.bf16.msra.mxu1 %v8860_v41 }
 0x271   :  { %6431 = vmatprep.subr.bf16.mxu1 %v8861_v48  ;;  %v1067_v48 = vld [vmem:[%s8727_s3] sm:$0xff] }
 0x274   :  { %6433 = vmatpush3.bf16.msra.mxu1 %v8862_v58  ;;  %v1969_v58 = vcombine.high %v1067_v48, %v1067_v48 }
 0x275   :  { %6435 = vmatprep.subr.bf16.mxu1 %v8863_v22  ;;  %v1975_v22 = vsel %vm1974_vm1, %v1067_v48, 0  ;;  %v6949_v48 = vld [vmem:[%s8728_s4 + $0x8] sm:$0xff]  }
 0x278   :  { %6437 = vmatpush3.bf16.msra.mxu1 %v8864_v46  ;;  %v7013_v46 = vmov 0.0  }
 0x279   :  { %6439 = vmatprep.subr.bf16.mxu1 %v8865_v30  ;;  %6024 = vmatprep.subr.mxu0 %v7013_v46  ;;  %v1977_v30 = vsel %vm1974_vm1, %v1969_v58, 0  ;;  %v6950_v58 = vld [vmem:[%s8728_s4 + $0x50] sm:$0xff]  }
 0x27a   :  { %6026 = vmatprep.mubr.msk.f32.mxu0 %vm7015_vm5, %v7013_v46 }
 0x27c   :  { %6441 = vmatpush3.bf16.msra.mxu1 %v8866_v33  ;;  %v8049_v33 = vand.u32 4294901760, %v1975_v22 }
 0x27d   :  { %6443 = vmatprep.subr.bf16.mxu1 %v8867_v37 }
 0x27e   :  { %v2064_v44 = vsub.f32 %v1975_v22, %v8049_v33  ;;  %v6951_v22 = vld [vmem:[%s8728_s4 + $0x10] sm:$0xff]  }
 0x280   :  { %6445 = vmatpush3.bf16.msra.mxu1 %v8868_v55  ;;  %v8051_v55 = vand.u32 4294901760, %v1977_v30  ;;  %v2065_v53 = vand.u32 4294901760, %v2064_v44 }
 0x281   :  { %6447 = vmatprep.subr.bf16.mxu1 %v8869_v36 }
 0x282   :  { %v2066_v49 = vsub.f32 %v2064_v44, %v2065_v53 }
 0x284   :  { %6449 = vmatpush3.bf16.msra.mxu1 %v8872_v6  ;;  %v8055_v6 = vsub.f32 %v1977_v30, %v8051_v55  ;;  %v6953_v30 = vld [vmem:[%s8728_s4 + $0x18] sm:$0xff]  }
 0x285   :  { %1980 = vmatprep.subr.mxu1 %v8051_v55 }
 0x286   :  { %v2059_v3 = vand.u32 4294901760, %v8055_v6 }
 0x287   :  { %1936 = vmatmul.mubr.f32.vlgmr.msra.gmra.mrb[10].mxu1 %v7914_v26 }
 0x288   :  { %2045 = vmatprep.mubr.f32.mxu1 %v7013_v46  ;;  %1982 = vmatpush1.msra.mxu1 %v8049_v33  ;;  %v2060_v28 = vsub.f32 %v8055_v6, %v2059_v3 }
 0x28a   :  { %v2061_v4 = vand.u32 4294901760, %v2060_v28  ;;  %v6961_v28 = vld [vmem:[%s8728_s4 + $0x38] sm:$0xff]  }
 0x28c   :  { %2062 = vmatprep.subr.mxu1 %v2061_v4  ;;  %v2636_v4 = vld [vmem:[%s8729_s5] sm:$0xff] }
 0x2ba   :  { %v5408_v42 = vpop.f32.mrb[0].mxu1 }
 0x2bb   :  { %v5409_v50 = vpop.f32.mrb[1].mxu1 }
 0x2bc   :  { %v5410_v32 = vadd.f32 %v5409_v50, %v5408_v42 }
 0x2da   :  { %v5443_v52 = vpop.f32.mrb[2].mxu1 }
 0x2db   :  { %v5444_v20 = vpop.f32.mrb[3].mxu1 }
 0x2dc   :  { %v5445_v1 = vadd.f32 %v5444_v20, %v5443_v52  ;;  %v6946_v20 = vld [vmem:[%s8728_s4 + $0x40] sm:$0xff]  }
 0x2de   :  { %v1420_v41 = vadd.f32 %v5445_v1, %v5410_v32  ;;  %v2067_v32 = vand.u32 4294901760, %v2066_v49  ;;  %v6947_v1 = vld [vmem:[%s8728_s4] sm:$0xff]  }
 0x2fa   :  { %v5478_v26 = vpop.f32.mrb[4].mxu1 }
 0x2fb   :  { %v5479_v37 = vpop.f32.mrb[5].mxu1 }
 0x2fc   :  { %v5480_v36 = vadd.f32 %v5479_v37, %v5478_v26  ;;  %v6952_v26 = vld [vmem:[%s8728_s4 + $0x58] sm:$0xff]   ;;  %v6955_v37 = vld [vmem:[%s8728_s4 + $0x20] sm:$0xff]  }
 0x2fe   :  { %v1558_v39 = vadd.f32 %v5480_v36, %v1420_v41  ;;  %v6948_v41 = vld [vmem:[%s8728_s4 + $0x48] sm:$0xff]  }
 0x2ff   :  { %v6957_v36 = vld [vmem:[%s8728_s4 + $0x28] sm:$0xff]  }
 0x31a   :  { %v5513_v5 = vpop.f32.mrb[6].mxu1 }
 0x31b   :  { %v5514_v34 = vpop.f32.mrb[7].mxu1 }
 0x31c   :  { %v5515_v8 = vadd.f32 %v5514_v34, %v5513_v5  ;;  %v2637_v5 = vld [vmem:[%s8729_s5 + $0x8] sm:$0xff]  ;;  %v7014_v34 = vmov 0.0|0.0  }
 0x31e   :  { %v1666_v15 = vadd.f32 %v5515_v8, %v1558_v39  ;;  %v6959_v39 = vld [vmem:[%s8728_s4 + $0x30] sm:$0xff]   ;;  %v2659_v8 = vand.u32 4294901760, %v2636_v4 }
 0x33a   :  { %v5548_v2 = vpop.f32.mrb[8].mxu1 }
 0x33b   :  { %v5549_v9 = vpop.f32.mrb[9].mxu1 }
 0x33c   :  { %v5550_v7 = vadd.f32 %v5549_v9, %v5548_v2  ;;  %v2638_v2 = vld [vmem:[%s8729_s5 + $0x10] sm:$0xff]  ;;  %v2639_v9 = vld [vmem:[%s8729_s5 + $0x18] sm:$0xff] }
 0x33e   :  { %v1834_v11 = vadd.f32 %v5550_v7, %v1666_v15  ;;  %v2662_v15 = vand.u32 4294901760, %v2637_v5  ;;  %v8137_v7 = vsub.f32 %v2636_v4, %v2659_v8  ;;  %v2651_v4 = vld [vmem:[%s8729_s5 + $0x78] sm:$0xff] }
 0x35a   :  { %v5583_v27 = vpop.f32.mrb[10].mxu1 }
 0x35b   :  { %v5584_v17 = vpop.f32.mrb[11].mxu1 }
 0x35c   :  { %v5585_v0 = vadd.f32 %v5584_v17, %v5583_v27  ;;  %v2665_v27 = vand.u32 4294901760, %v2638_v2  ;;  %v2668_v17 = vand.u32 4294901760, %v2639_v9 }
 0x35e   :  { %v1938_v23 = vadd.f32 %v5585_v0, %v1834_v11  ;;  %v8139_v11 = vsub.f32 %v2637_v5, %v2662_v15  ;;  %v8141_v0 = vsub.f32 %v2638_v2, %v2665_v27 }
 0x360   :  { %v1942_v14 = vsel %vm1941_vm2, %v1938_v23, 0.0  ;;  %v1951_v29 = vrot.slane %v1938_v23, 2  ;;  %v8143_v23 = vsub.f32 %v2639_v9, %v2668_v17 }
 0x361   :  { %v1943_v24 = vrot.slane %v1942_v14, 4 }
 0x362   :  { %v1953_v40 = vsel %vm1941_vm2, %v1951_v29, 0.0  ;;  %v2641_v29 = vld [vmem:[%s8729_s5 + $0x28] sm:$0xff] }
 0x363   :  { %v1944_v25 = vadd.f32 %v1943_v24, %v1942_v14  ;;  %v1954_v61 = vrot.slane %v1953_v40, 4  ;;  %v2640_v14 = vld [vmem:[%s8729_s5 + $0x20] sm:$0xff] }
 0x364   :  { %v2671_v24 = vand.u32 4294901760, %v2640_v14 }
 0x365   :  { %v1945_v59 = vrot.slane %v1944_v25, 2  ;;  %v1955_v16 = vadd.f32 %v1954_v61, %v1953_v40  ;;  %v2674_v40 = vand.u32 4294901760, %v2641_v29 }
 0x367   :  { %v1946_v60 = vadd.f32 %v1945_v59, %v1944_v25  ;;  %v1956_v62 = vrot.slane %v1955_v16, 2  ;;  %v8151_v25 = vsub.f32 %v2640_v14, %v2671_v24  ;;  %v8153_v61 = vsub.f32 %v2641_v29, %v2674_v40  ;;  %v2642_v59 = vld [vmem:[%s8729_s5 + $0x30] sm:$0xff] }
 0x368   :  { %v2704_v14 = vand.u32 4294901760, %v2651_v4  ;;  %v2752_v29 = vand.u32 4294901760, %v8137_v7 }
 0x369   :  { %v1947_v54 = vrot.slane %v1946_v60, 1  ;;  %v1957_v10 = vadd.f32 %v1956_v62, %v1955_v16  ;;  %v2643_v16 = vld [vmem:[%s8729_s5 + $0x38] sm:$0xff] }
 0x36a   :  { %v2680_v62 = vand.u32 4294901760, %v2643_v16 }
 0x36b   :  { %v1948_v47 = vadd.f32 %v1947_v54, %v1946_v60  ;;  %v1958_v35 = vrot.slane %v1957_v10, 1  ;;  %v2677_v60 = vand.u32 4294901760, %v2642_v59 }
 0x36d   :  { %v1949_v63 = vmul.f32 0.0078125, %v1948_v47  ;;  %v1959_v19 = vadd.f32 %v1958_v35, %v1957_v10  ;;  %v8161_v54 = vsub.f32 %v2642_v59, %v2677_v60  ;;  %v8163_v10 = vsub.f32 %v2643_v16, %v2680_v62  ;;  %v8918_v47 = vld [vmem:[#allocation5_spill] sm:$0xff] }
 0x36e   :  { %v8166_v35 = vsub.s32 0, %v8918_v47  ;;  %v8247_v16 = vsub.f32 %v2651_v4, %v2704_v14 }
 0x36f   :  { %v1960_v31 = vmul.f32 0.0078125, %v1959_v19  ;;  %v1961_v18 = vmul.f32 %v1949_v63, %v1949_v63 }
 0x371   :  { %v1962_v38 = vsub.f32 %v1960_v31, %v1961_v18 }
 0x373   :  { %v1963_v21 = vmax.f32 %v1962_v38, 0.0 }
 0x375   :  { %v1964_v43 = vadd.f32 1e-05, %v1963_v21  ;;  %v8919_v21 = vld [vmem:[#allocation35_spill] sm:$0xff] }
 0x377   :  { %6978 = vrsqrt.f32 %v1964_v43 }
 0x381   :  { %v6979_v45 = vpop.eup %6978 }
 0x382   :  { %v1967_v51 = vsel %vm1966_vm3, %v1949_v63, %v6979_v45  ;;  %v8169_v63 = vsub.s32 1, %v8918_v47  ;;  %v2766_v47 = vand.u32 4294901760, %v8141_v0 }
 0x383   :  { %v1972_v13 = vsel %vm1970_vm4, %v1967_v51, 0 }
 0x384   :  { %v2046_v56 = vand.u32 4294901760, %v1972_v13 }
 0x386   :  { %v2047_v12 = vsub.f32 %v1972_v13, %v2046_v56 }
 0x388   :  { %v2048_v42 = vand.u32 4294901760, %v2047_v12 }
 0x38a   :  { %v2049_v50 = vsub.f32 %v2047_v12, %v2048_v42 }
 0x38c   :  { %v2050_v52 = vand.u32 4294901760, %v2049_v50 }
 0x38e   :  { %2051 = vmatmul.mubr.f32.vlgmr.msra.gmra.mrb[12].mxu1 %v2050_v52  ;;  %v8188_v52 = vpack.c.bf16 %v2680_v62, %v2677_v60  ;;  %v2753_v60 = vsub.f32 %v8137_v7, %v2752_v29 }
 0x38f   :  { %2068 = vmatpush1.msra.mxu1 %v2067_v32  ;;  %2131 = vmatprep.mubr.f32.mxu1 %v7013_v46  ;;  %v8180_v32 = vpack.c.bf16 %v2668_v17, %v2665_v27 }
 0x390   :  { %2141 = vmatprep.subr.mxu1 %v8055_v6  ;;  %v6958_v6 = vld [vmem:[%s8728_s4 + $0x70] sm:$0xff]  }
 0x396   :  { %2133 = vmatmul.mubr.f32.vlgmr.msra.gmra.mrb[12].mxu1 %v2046_v56 }
 0x397   :  { %2144 = vmatpush1.msra.mxu1 %v2064_v44  ;;  %2207 = vmatprep.mubr.f32.mxu1 %v7013_v46 }
 0x398   :  { %2217 = vmatprep.subr.mxu1 %v8051_v55 }
 0x39e   :  { %2210 = vmatmul.mubr.f32.vlgmr.msra.gmra.mrb[12].mxu1 %v2047_v12 }
 0x39f   :  { %2219 = vmatpush1.msra.mxu1 %v8049_v33  ;;  %2282 = vmatprep.mubr.f32.mxu1 %v7013_v46 }
 0x3a0   :  { %2295 = vmatprep.subr.mxu1 %v2059_v3  ;;  %v6960_v3 = vld [vmem:[%s8728_s4 + $0x78] sm:$0xff]  }
 0x3a6   :  { %2286 = vmatmul.mubr.f32.vlgmr.msra.gmra.mrb[12].mxu1 %v2048_v42  ;;  %v8177_v42 = vpack.c.bf16 %v2662_v15, %v2659_v8 }
 0x3a7   :  { %2299 = vmatpush1.msra.mxu1 %v2065_v53  ;;  %2362 = vmatprep.mubr.f32.mxu1 %v7013_v46 }
 0x3a8   :  { %2371 = vmatprep.subr.mxu1 %v8051_v55  ;;  %v6956_v55 = vld [vmem:[%s8728_s4 + $0x68] sm:$0xff]  }
 0x3ae   :  { %2364 = vmatmul.mubr.f32.vlgmr.msra.gmra.mrb[12].mxu1 %v2046_v56 }
 0x3af   :  { %2373 = vmatpush1.msra.mxu1 %v8049_v33  ;;  %2436 = vmatprep.mubr.f32.mxu1 %v7013_v46  ;;  %v6954_v33 = vld [vmem:[%s8728_s4 + $0x60] sm:$0xff]  }
 0x3b0   :  { %5586 = vmatprep.subr.bf16.mxu1 %v6946_v20  ;;  %v2644_v20 = vld [vmem:[%s8729_s5 + $0x40] sm:$0xff] }
 0x3b6   :  { %2438 = vmatmul.mubr.f32.vlgmr.msra.gmra.mrb[12].mxu1 %v2046_v56 }
 0x3b7   :  { %5587 = vmatpush3.bf16.msra.mxu1 %v6947_v1  ;;  %v2645_v1 = vld [vmem:[%s8729_s5 + $0x48] sm:$0xff] }
 0x3b8   :  { %5588 = vmatprep.subr.bf16.mxu1 %v6948_v41  ;;  %v2683_v41 = vand.u32 4294901760, %v2644_v20 }
 0x3ba   :  { %v8227_v5 = vsub.f32 %v2644_v20, %v2683_v41  ;;  %v2794_v20 = vand.u32 4294901760, %v8161_v54 }
 0x3bb   :  { %5589 = vmatpush3.bf16.msra.mxu1 %v6949_v48  ;;  %v2686_v48 = vand.u32 4294901760, %v2645_v1 }
 0x3bc   :  { %5590 = vmatprep.subr.bf16.mxu1 %v6950_v58 }
 0x3bd   :  { %v8199_v58 = vpack.c.bf16 %v2686_v48, %v2683_v41  ;;  %v8229_v8 = vsub.f32 %v2645_v1, %v2686_v48  ;;  %v8825_v1 = vand.u32 4294901760, %v8163_v10  ;;  %v2795_v48 = vsub.f32 %v8161_v54, %v2794_v20 }
 0x3bf   :  { %5591 = vmatpush3.bf16.msra.mxu1 %v6951_v22  ;;  %v2646_v22 = vld [vmem:[%s8729_s5 + $0x50] sm:$0xff] }
 0x3c0   :  { %5592 = vmatprep.subr.bf16.mxu1 %v6952_v26  ;;  %v2647_v26 = vld [vmem:[%s8729_s5 + $0x58] sm:$0xff] }
 0x3c3   :  { %5593 = vmatpush3.bf16.msra.mxu1 %v6953_v30  ;;  %v2689_v30 = vand.u32 4294901760, %v2646_v22 }
 0x3c4   :  { %5594 = vmatprep.subr.bf16.mxu1 %v6954_v33  ;;  %v2692_v33 = vand.u32 4294901760, %v2647_v26 }
 0x3c5   :  { %v8231_v15 = vsub.f32 %v2646_v22, %v2689_v30  ;;  %v2802_v22 = vsub.f32 %v8163_v10, %v8825_v1 }
 0x3c6   :  { %v8233_v2 = vsub.f32 %v2647_v26, %v2692_v33  ;;  %v2796_v26 = vand.u32 4294901760, %v2795_v48 }
 0x3c7   :  { %5595 = vmatpush3.bf16.msra.mxu1 %v6955_v37  ;;  %v8209_v37 = vpack.c.bf16 %v2692_v33, %v2689_v30  ;;  %v2803_v30 = vand.u32 4294901760, %v2802_v22  ;;  %v8824_v33 = vand.u32 4294901760, %v8227_v5  ;;  %v8817_v22 = vand.u32 4294901760, %v8247_v16 }
 0x3c8   :  { %5596 = vmatprep.subr.bf16.mxu1 %v6956_v55  ;;  %v2648_v55 = vld [vmem:[%s8729_s5 + $0x60] sm:$0xff] }
 0x3cb   :  { %5597 = vmatpush3.bf16.msra.mxu1 %v6957_v36  ;;  %v2649_v36 = vld [vmem:[%s8729_s5 + $0x68] sm:$0xff] }
 0x3cc   :  { %5598 = vmatprep.subr.bf16.mxu1 %v6958_v6  ;;  %v2695_v6 = vand.u32 4294901760, %v2648_v55 }
 0x3ce   :  { %v8236_v9 = vsub.f32 %v2648_v55, %v2695_v6  ;;  %v8823_v55 = vand.u32 4294901760, %v8229_v8 }
 0x3cf   :  { %5599 = vmatpush3.bf16.msra.mxu1 %v6959_v39  ;;  %v2698_v39 = vand.u32 4294901760, %v2649_v36 }
 0x3d0   :  { %5600 = vmatprep.subr.bf16.mxu1 %v6960_v3 }
 0x3d1   :  { %v8219_v3 = vpack.c.bf16 %v2698_v39, %v2695_v6  ;;  %v8238_v27 = vsub.f32 %v2649_v36, %v2698_v39  ;;  %v6484_v36 = vpack.c.bf16 %v2803_v30, %v2796_v26  ;;  %v2809_v6 = vsub.f32 %v8227_v5, %v8824_v33 }
 0x3d2   :  { %v2816_v39 = vsub.f32 %v8229_v8, %v8823_v55 }
 0x3d3   :  { %5601 = vmatpush3.bf16.msra.mxu1 %v6961_v28  ;;  %v2650_v28 = vld [vmem:[%s8729_s5 + $0x70] sm:$0xff] }
 0x3d4   :  { %6450 = vmatprep.subr.bf16.mxu1 %v7014_v34  ;;  %v2701_v17 = vand.u32 4294901760, %v2650_v28  ;;  %v2817_v4 = vand.u32 4294901760, %v2816_v39 }
 0x3d6   :  { %v8245_v59 = vsub.f32 %v2650_v28, %v2701_v17  ;;  %v2810_v28 = vand.u32 4294901760, %v2809_v6  ;;  %v2858_v6 = vsub.f32 %v8247_v16, %v8817_v22 }
 0x3d8   :  { %v8818_v48 = vand.u32 4294901760, %v8245_v59 }
 0x3da   :  { %v2851_v30 = vsub.f32 %v8245_v59, %v8818_v48 }
 0x3dc   :  { %v2852_v39 = vand.u32 4294901760, %v2851_v30 }
 0x489   :  { %v2439_v19 = vpop.f32.mrb[12].mxu1 }
 0x48a   :  { %v2447_v31 = vrot.slane %v2439_v19, %v8166_v35  ;;  %v2441_v18 = vpop.f32.mrb[13].mxu1  ;;  %v2457_v44 = vrot.slane %v2439_v19, %v8169_v63  ;;  %v2773_v19 = vand.u32 4294901760, %v8143_v23 }
 0x48b   :  { %v2451_v38 = vrot.slane %v2441_v18, %v8166_v35  ;;  %v2461_v51 = vrot.slane %v2441_v18, %v8169_v63 }
 0x48c   :  { %v2452_v43 = vsub.f32 %v8919_v21, %v2447_v31  ;;  %v2754_v31 = vand.u32 4294901760, %v2753_v60  ;;  %v2774_v21 = vsub.f32 %v8143_v23, %v2773_v19  ;;  %v6487_v60 = vpack.c.bf16 %v2817_v4, %v2810_v28 }
 0x48d   :  { %v2453_v45 = vsub.f32 %v7908_v57, %v2451_v38  ;;  %v8184_v57 = vpack.c.bf16 %v2674_v40, %v2671_v24  ;;  %v2759_v24 = vand.u32 4294901760, %v8139_v11  ;;  %v8243_v40 = vpack.c.bf16 %v2704_v14, %v2701_v17 }
 0x48e   :  { %v2462_v13 = vmul.f32 %v2457_v44, %v2452_v43  ;;  %v2767_v38 = vsub.f32 %v8141_v0, %v2766_v47  ;;  %v8822_v17 = vand.u32 4294901760, %v8231_v15  ;;  %v8821_v14 = vand.u32 4294901760, %v8233_v2 }
 0x48f   :  { %v2463_v53 = vmul.f32 %v2461_v51, %v2453_v45  ;;  %v2760_v62 = vsub.f32 %v8139_v11, %v2759_v24  ;;  %v2775_v45 = vand.u32 4294901760, %v2774_v21  ;;  %v2780_v51 = vand.u32 4294901760, %v8151_v25 }
 0x490   :  { %v2464_v56 = vmax.f32 %v2462_v13, 0.0  ;;  %v2768_v44 = vand.u32 4294901760, %v2767_v38  ;;  %v2787_v13 = vand.u32 4294901760, %v8153_v61  ;;  %v8820_v21 = vand.u32 4294901760, %v8236_v9 }
 0x491   :  { %v2465_v12 = vmax.f32 %v2463_v53, 0.0  ;;  %v2761_v18 = vand.u32 4294901760, %v2760_v62  ;;  %v2823_v62 = vsub.f32 %v8231_v15, %v8822_v17  ;;  %v2859_v28 = vand.u32 4294901760, %v2858_v6 }
 0x492   :  { %v2466_v50 = vpack.c.bf16 %v2464_v56, %v2464_v56  ;;  %v8273_v53 = vpack.c.bf16 %v2775_v45, %v2768_v44  ;;  %v2781_v56 = vsub.f32 %v8151_v25, %v2780_v51  ;;  %v8819_v44 = vand.u32 4294901760, %v8238_v27 }
 0x493   :  { %v2467_v49 = vpack.c.bf16 %v2465_v12, %v2465_v12  ;;  %v8269_v43 = vpack.c.bf16 %v2761_v18, %v2754_v31  ;;  %v2788_v12 = vsub.f32 %v8153_v61, %v2787_v13  ;;  %v2830_v31 = vsub.f32 %v8233_v2, %v8821_v14 }
 0x494   :  { %v2824_v18 = vand.u32 4294901760, %v2823_v62  ;;  %v6496_v4 = vpack.c.bf16 %v2859_v28, %v2852_v39  ;;  %v6499_v62 = vpack.c.bf16 %v8139_v11, %v8137_v7  ;;  %v6553_v7 = vpack.c.bf16 %v2787_v13, %v2780_v51 }
 0x495   :  { %2628 = vmatprep.mubr.bf16.mxu1 %v2467_v49  ;;  %v2782_v49 = vand.u32 4294901760, %v2781_v56  ;;  %v2831_v38 = vand.u32 4294901760, %v2830_v31  ;;  %v2837_v56 = vsub.f32 %v8236_v9, %v8820_v21  ;;  %v6502_v31 = vpack.c.bf16 %v8143_v23, %v8141_v0 }
 0x496   :  { %2629 = vmatmul.mubr.bf16.vlgmr.msra.gmra.mrb[16].mxu1 %v2466_v50  ;;  %v2789_v50 = vand.u32 4294901760, %v2788_v12  ;;  %v2844_v12 = vsub.f32 %v8238_v27, %v8819_v44  ;;  %v8920_v11 = vand.u32 4294901760, %v8163_v10  ;;  %v8921_v23 = vand.u32 4294901760, %v8227_v5 }
 0x497   :  { %6452 = vmatpush3.bf16.msra.mxu1 %v8177_v42  ;;  %5846 = vmatprep.mubr.msk.f32.mxu1 %vm7015_vm5, %v7013_v46  ;;  %v6490_v45 = vpack.c.bf16 %v2831_v38, %v2824_v18  ;;  %v6505_v18 = vpack.c.bf16 %v8153_v61, %v8151_v25  ;;  %v6508_v38 = vpack.c.bf16 %v8163_v10, %v8161_v54  ;;  %v8923_v25 = vand.u32 4294901760, %v8231_v15 }
 0x498   :  { %6453 = vmatprep.subr.bf16.mxu1 %v7014_v34  ;;  %v6481_v41 = vpack.c.bf16 %v2789_v50, %v2782_v49  ;;  %v2838_v49 = vand.u32 4294901760, %v2837_v56  ;;  %v2845_v50 = vand.u32 4294901760, %v2844_v12  ;;  %v6511_v56 = vpack.c.bf16 %v8229_v8, %v8227_v5 }
 0x499   :  { %v6514_v12 = vpack.c.bf16 %v8233_v2, %v8231_v15  ;;  %v6556_v0 = vpack.c.bf16 %v8920_v11, %v2794_v20  ;;  %v8924_v61 = vand.u32 4294901760, %v8233_v2  ;;  %v8925_v54 = vand.u32 4294901760, %v8236_v9 }
 0x49a   :  { %v6493_v26 = vpack.c.bf16 %v2845_v50, %v2838_v49  ;;  %v6517_v49 = vpack.c.bf16 %v8238_v27, %v8236_v9  ;;  %v6520_v50 = vpack.c.bf16 %v8247_v16, %v8245_v59  ;;  %v8926_v10 = vand.u32 4294901760, %v8238_v27 }
 0x49b   :  { %6455 = vmatpush3.bf16.msra.mxu1 %v8180_v32  ;;  %v8927_v5 = vand.u32 4294901760, %v8245_v59 }
 0x49c   :  { %6456 = vmatprep.subr.bf16.mxu1 %v7014_v34 }
 0x49f   :  { %6458 = vmatpush3.bf16.msra.mxu1 %v8184_v57 }
 0x4a0   :  { %6459 = vmatprep.subr.bf16.mxu1 %v7014_v34 }
 0x4a3   :  { %6461 = vmatpush3.bf16.msra.mxu1 %v8188_v52 }
 0x4a4   :  { %6462 = vmatprep.subr.bf16.mxu1 %v7014_v34 }
 0x4a7   :  { %6464 = vmatpush3.bf16.msra.mxu1 %v8199_v58 }
 0x4a8   :  { %6465 = vmatprep.subr.bf16.mxu1 %v7014_v34 }
 0x4ab   :  { %6467 = vmatpush3.bf16.msra.mxu1 %v8209_v37 }
 0x4ac   :  { %6468 = vmatprep.subr.bf16.mxu1 %v7014_v34 }
 0x4af   :  { %6470 = vmatpush3.bf16.msra.mxu1 %v8219_v3 }
 0x4b0   :  { %6471 = vmatprep.subr.bf16.mxu1 %v7014_v34 }
 0x4b3   :  { %6473 = vmatpush3.bf16.msra.mxu1 %v8243_v40 }
 0x4b4   :  { %6474 = vmatprep.subr.bf16.mxu1 %v7014_v34 }
 0x569   :  { %v5602_v30 = vpop.f32.mrb[16].mxu1 }
 0x56a   :  { %v5603_v6 = vpop.f32.mrb[17].mxu1 }
 0x56b   :  { %v8337_v39 = vadd.f32 %v5603_v6, %v5602_v30  ;;  %v5605_v28 = vpop.f32.mrb[18].mxu1  ;;  %v6964_v30 = vld [vmem:[%s8731_s7 + $0x10] sm:$0xff]   ;;  %v6965_v6 = vld [vmem:[%s8731_s7 + $0x18] sm:$0xff]  }
 0x56c   :  { %v5606_v22 = vpop.f32.mrb[19].mxu1  ;;  %v6966_v28 = vld [vmem:[%s8731_s7 + $0x20] sm:$0xff]  }
 0x56d   :  { %v2653_v48 = vmul.f32 %v8337_v39, %v8337_v39 }
 0x56f   :  { %v2655_v44 = vrot.slane %v2653_v48, 6 }
 0x571   :  { %v2657_v21 = vsel %vm1076_vm0, %v8337_v39, %v2655_v44 }
 0x572   :  { %v8343_v14 = vand.u32 4294901760, %v2657_v21 }
 0x574   :  { %v2740_v17 = vsub.f32 %v2657_v21, %v8343_v14 }
 0x576   :  { %v2741_v55 = vand.u32 4294901760, %v2740_v17 }
 0x578   :  { %v2742_v33 = vsub.f32 %v2740_v17, %v2741_v55 }
 0x57a   :  { %v2743_v1 = vand.u32 4294901760, %v2742_v33 }
 0x57c   :  { %5847 = vmatmul.mubr.f32.vlgmr.msra.gmra.mrb[14].mxu1 %v2743_v1 }
 0x57d   :  { %6476 = vmatpush3.bf16.msra.mxu1 %v8269_v43  ;;  %5881 = vmatprep.mubr.msk.f32.mxu1 %vm7015_vm5, %v7013_v46  ;;  %v6547_v43 = vpack.c.bf16 %v2759_v24, %v2752_v29  ;;  %v8922_v29 = vand.u32 4294901760, %v8229_v8  ;;  %v8928_v8 = vand.u32 4294901760, %v8247_v16 }
 0x57e   :  { %6477 = vmatprep.subr.bf16.mxu1 %v7014_v34 }
 0x57f   :  { %v6559_v24 = vpack.c.bf16 %v8922_v29, %v8921_v23  ;;  %v6568_v51 = vpack.c.bf16 %v8928_v8, %v8927_v5  ;;  %v3893_v8 = vld [vmem:[%s8732_s8 + $0x10] sm:$0xff] }
 0x581   :  { %6479 = vmatpush3.bf16.msra.mxu1 %v8273_v53  ;;  %v6550_v53 = vpack.c.bf16 %v2773_v19, %v2766_v47  ;;  %v6562_v47 = vpack.c.bf16 %v8924_v61, %v8923_v25  ;;  %v6565_v19 = vpack.c.bf16 %v8926_v10, %v8925_v54  ;;  %v3891_v54 = vld [vmem:[%s8732_s8] sm:$0xff]  ;;  %v3892_v10 = vld [vmem:[%s8732_s8 + $0x8] sm:$0xff] }
 0x582   :  { %6480 = vmatprep.subr.bf16.mxu1 %v7014_v34  ;;  %v3914_v5 = vand.u32 4294901760, %v3892_v10 }
 0x585   :  { %6482 = vmatpush3.bf16.msra.mxu1 %v6481_v41 }
 0x586   :  { %6483 = vmatprep.subr.bf16.mxu1 %v7014_v34 }
 0x589   :  { %6485 = vmatpush3.bf16.msra.mxu1 %v6484_v36 }
 0x58a   :  { %6486 = vmatprep.subr.bf16.mxu1 %v7014_v34 }
 0x58d   :  { %6488 = vmatpush3.bf16.msra.mxu1 %v6487_v60 }
 0x58e   :  { %6489 = vmatprep.subr.bf16.mxu1 %v7014_v34 }
 0x591   :  { %6491 = vmatpush3.bf16.msra.mxu1 %v6490_v45 }
 0x592   :  { %6492 = vmatprep.subr.bf16.mxu1 %v7014_v34 }
 0x595   :  { %6494 = vmatpush3.bf16.msra.mxu1 %v6493_v26 }
 0x596   :  { %6495 = vmatprep.subr.bf16.mxu1 %v7014_v34 }
 0x599   :  { %6497 = vmatpush3.bf16.msra.mxu1 %v6496_v4 }
 0x59a   :  { %6498 = vmatprep.subr.bf16.mxu1 %v7014_v34 }
 0x59c   :  { %5882 = vmatmul.mubr.f32.vlgmr.msra.gmra.mrb[14].mxu1 %v8343_v14 }
 0x59d   :  { %6500 = vmatpush3.bf16.msra.mxu1 %v6499_v62  ;;  %5916 = vmatprep.mubr.msk.f32.mxu1 %vm7015_vm5, %v7013_v46 }
 0x59e   :  { %6501 = vmatprep.subr.bf16.mxu1 %v7014_v34 }
 0x5a1   :  { %6503 = vmatpush3.bf16.msra.mxu1 %v6502_v31 }
 0x5a2   :  { %6504 = vmatprep.subr.bf16.mxu1 %v7014_v34 }
 0x5a5   :  { %6506 = vmatpush3.bf16.msra.mxu1 %v6505_v18 }
 0x5a6   :  { %6507 = vmatprep.subr.bf16.mxu1 %v7014_v34 }
 0x5a9   :  { %6509 = vmatpush3.bf16.msra.mxu1 %v6508_v38 }
 0x5aa   :  { %6510 = vmatprep.subr.bf16.mxu1 %v7014_v34 }
 0x5ad   :  { %6512 = vmatpush3.bf16.msra.mxu1 %v6511_v56 }
 0x5ae   :  { %6513 = vmatprep.subr.bf16.mxu1 %v7014_v34 }
 0x5b1   :  { %6515 = vmatpush3.bf16.msra.mxu1 %v6514_v12 }
 0x5b2   :  { %6516 = vmatprep.subr.bf16.mxu1 %v7014_v34 }
 0x5b5   :  { %6518 = vmatpush3.bf16.msra.mxu1 %v6517_v49  ;;  %v6962_v49 = vld [vmem:[%s8731_s7] sm:$0xff]  }
 0x5b6   :  { %6519 = vmatprep.subr.bf16.mxu1 %v7014_v34 }
 0x5b9   :  { %6521 = vmatpush3.bf16.msra.mxu1 %v6520_v50  ;;  %v6963_v50 = vld [vmem:[%s8731_s7 + $0x8] sm:$0xff]  }
 0x5ba   :  { %6522 = vmatprep.subr.bf16.mxu1 %v7014_v34 }
 0x5bc   :  { %5917 = vmatmul.mubr.f32.vlgmr.msra.gmra.mrb[14].mxu1 %v2740_v17 }
 0x5bd   :  { %6524 = vmatpush3.bf16.msra.mxu1 %v8177_v42  ;;  %5951 = vmatprep.mubr.msk.f32.mxu1 %vm7015_vm5, %v7013_v46 }
 0x5be   :  { %6525 = vmatprep.subr.bf16.mxu1 %v7014_v34 }
 0x5c1   :  { %6527 = vmatpush3.bf16.msra.mxu1 %v8180_v32 }
 0x5c2   :  { %6528 = vmatprep.subr.bf16.mxu1 %v7014_v34 }
 0x5c5   :  { %6530 = vmatpush3.bf16.msra.mxu1 %v8184_v57 }
 0x5c6   :  { %6531 = vmatprep.subr.bf16.mxu1 %v7014_v34 }
 0x5c9   :  { %6533 = vmatpush3.bf16.msra.mxu1 %v8188_v52 }
 0x5ca   :  { %6534 = vmatprep.subr.bf16.mxu1 %v7014_v34 }
 0x5cd   :  { %6536 = vmatpush3.bf16.msra.mxu1 %v8199_v58 }
 0x5ce   :  { %6537 = vmatprep.subr.bf16.mxu1 %v7014_v34 }
 0x5d1   :  { %6539 = vmatpush3.bf16.msra.mxu1 %v8209_v37 }
 0x5d2   :  { %6540 = vmatprep.subr.bf16.mxu1 %v7014_v34 }
 0x5d5   :  { %6542 = vmatpush3.bf16.msra.mxu1 %v8219_v3 }
 0x5d6   :  { %6543 = vmatprep.subr.bf16.mxu1 %v7014_v34 }
 0x5d9   :  { %6545 = vmatpush3.bf16.msra.mxu1 %v8243_v40 }
 0x5da   :  { %6546 = vmatprep.subr.bf16.mxu1 %v7014_v34 }
 0x5dc   :  { %5952 = vmatmul.mubr.f32.vlgmr.msra.gmra.mrb[14].mxu1 %v2741_v55 }
 0x5dd   :  { %6548 = vmatpush3.bf16.msra.mxu1 %v6547_v43  ;;  %5986 = vmatprep.mubr.msk.f32.mxu1 %vm7015_vm5, %v7013_v46  ;;  %v6967_v43 = vld [vmem:[%s8731_s7 + $0x28] sm:$0xff]  }
 0x5de   :  { %6549 = vmatprep.subr.bf16.mxu1 %v7014_v34 }
 0x5e1   :  { %6551 = vmatpush3.bf16.msra.mxu1 %v6550_v53  ;;  %v6968_v53 = vld [vmem:[%s8731_s7 + $0x30] sm:$0xff]  }
 0x5e2   :  { %6552 = vmatprep.subr.bf16.mxu1 %v7014_v34 }
 0x5e5   :  { %6554 = vmatpush3.bf16.msra.mxu1 %v6553_v7  ;;  %v6969_v7 = vld [vmem:[%s8731_s7 + $0x38] sm:$0xff]  }
 0x5e6   :  { %6555 = vmatprep.subr.bf16.mxu1 %v7014_v34 }
 0x5e9   :  { %6557 = vmatpush3.bf16.msra.mxu1 %v6556_v0 }
 0x5ea   :  { %6558 = vmatprep.subr.bf16.mxu1 %v7014_v34 }
 0x5ed   :  { %6560 = vmatpush3.bf16.msra.mxu1 %v6559_v24 }
 0x5ee   :  { %6561 = vmatprep.subr.bf16.mxu1 %v7014_v34 }
 0x5f1   :  { %6563 = vmatpush3.bf16.msra.mxu1 %v6562_v47 }
 0x5f2   :  { %6564 = vmatprep.subr.bf16.mxu1 %v7014_v34 }
 0x5f5   :  { %6566 = vmatpush3.bf16.msra.mxu1 %v6565_v19  ;;  %v3911_v19 = vand.u32 4294901760, %v3891_v54 }
 0x5f6   :  { %6567 = vmatprep.subr.bf16.mxu1 %v7014_v34 }
 0x5f9   :  { %6569 = vmatpush3.bf16.msra.mxu1 %v6568_v51  ;;  %v3894_v51 = vld [vmem:[%s8732_s8 + $0x18] sm:$0xff] }
 0x5fa   :  { %6570 = vmatprep.subr.bf16.mxu1 %v7014_v34 }
 0x5fc   :  { %5987 = vmatmul.mubr.f32.vlgmr.msra.gmra.mrb[14].mxu1 %v8343_v14 }
 0x5fd   :  { %6572 = vmatpush3.bf16.msra.mxu1 %v8177_v42  ;;  %6021 = vmatprep.mubr.msk.f32.mxu1 %vm7015_vm5, %v7013_v46  ;;  %v2652_v42 = vld [vmem:[%s8730_s6] sm:$0xff] }
 0x5fe   :  { %6573 = vmatprep.subr.bf16.mxu1 %v7014_v34 }
 0x601   :  { %6575 = vmatpush3.bf16.msra.mxu1 %v8180_v32  ;;  %v3330_v32 = vand.u32 4294901760, %v2652_v42 }
 0x602   :  { %6576 = vmatprep.subr.bf16.mxu1 %v7014_v34 }
 0x603   :  { %6025 = vmatpush3.msra.mxu0 %v3330_v32  ;;  %v3407_v44 = vsub.f32 %v2652_v42, %v3330_v32  ;;  %v3917_v42 = vand.u32 4294901760, %v3893_v8 }
 0x604   :  { %6029 = vmatprep.subr.mxu0 %v7013_v46 }
 0x605   :  { %6578 = vmatpush3.bf16.msra.mxu1 %v8184_v57  ;;  %v3408_v26 = vand.u32 4294901760, %v3407_v44 }
 0x606   :  { %6579 = vmatprep.subr.bf16.mxu1 %v7014_v34 }
 0x607   :  { %v3409_v31 = vsub.f32 %v3407_v44, %v3408_v26 }
 0x609   :  { %6581 = vmatpush3.bf16.msra.mxu1 %v8188_v52  ;;  %v3410_v56 = vand.u32 4294901760, %v3409_v31 }
 0x60a   :  { %6582 = vmatprep.subr.bf16.mxu1 %v7014_v34 }
 0x60d   :  { %6584 = vmatpush3.bf16.msra.mxu1 %v8199_v58 }
 0x60e   :  { %6585 = vmatprep.subr.bf16.mxu1 %v7014_v34 }
 0x611   :  { %6587 = vmatpush3.bf16.msra.mxu1 %v8209_v37 }
 0x612   :  { %6588 = vmatprep.subr.bf16.mxu1 %v7014_v34 }
 0x615   :  { %6590 = vmatpush3.bf16.msra.mxu1 %v8219_v3 }
 0x616   :  { %6591 = vmatprep.subr.bf16.mxu1 %v7014_v34 }
 0x619   :  { %6593 = vmatpush3.bf16.msra.mxu1 %v8243_v40 }
 0x61a   :  { %6242 = vmatprep.subr.bf16.mxu1 %v7013_v46 }
 0x61c   :  { %6022 = vmatmul.mubr.f32.vlgmr.msra.gmra.mrb[14].mxu1 %v8343_v14 }
 0x61d   :  { %6246 = vmatprep.mubr.msk.bf16.mxu1 %vm7015_vm5, %v7013_v46 }
 0x6ef   :  { %v3295_v57 = vpop.f32.mrb[14].mxu1 }
 0x6f0   :  { %v3300_v52 = vsel %vm3299_vm6, %v3295_v57, 0.0  ;;  %v3309_v58 = vrot.slane %v3295_v57, 2  ;;  %v6023_v37 = vpop.f32.mrb[15].mxu1 }
 0x6f1   :  { %v3301_v3 = vrot.slane %v3300_v52, 4 }
 0x6f2   :  { %v3311_v15 = vsel %vm3299_vm6, %v3309_v58, 0.0  ;;  %v3896_v58 = vld [vmem:[%s8732_s8 + $0x28] sm:$0xff] }
 0x6f3   :  { %v3302_v2 = vadd.f32 %v3301_v3, %v3300_v52  ;;  %v3312_v9 = vrot.slane %v3311_v15, 4  ;;  %v3895_v52 = vld [vmem:[%s8732_s8 + $0x20] sm:$0xff]  ;;  %v3926_v3 = vand.u32 4294901760, %v3896_v58 }
 0x6f4   :  { %v3923_v37 = vand.u32 4294901760, %v3895_v52 }
 0x6f5   :  { %v3303_v27 = vrot.slane %v3302_v2, 2  ;;  %v3313_v40 = vadd.f32 %v3312_v9, %v3311_v15  ;;  %v8536_v15 = vsub.f32 %v3891_v54, %v3911_v19 }
 0x6f6   :  { %v8540_v9 = vpack.c.bf16 %v3926_v3, %v3923_v37 }
 0x6f7   :  { %v3304_v59 = vadd.f32 %v3303_v27, %v3302_v2  ;;  %v3314_v16 = vrot.slane %v3313_v40, 2  ;;  %v8538_v2 = vsub.f32 %v3892_v10, %v3914_v5  ;;  %v3897_v27 = vld [vmem:[%s8732_s8 + $0x30] sm:$0xff] }
 0x6f9   :  { %v3305_v13 = vrot.slane %v3304_v59, 1  ;;  %v3315_v20 = vadd.f32 %v3314_v16, %v3313_v40  ;;  %v3898_v40 = vld [vmem:[%s8732_s8 + $0x38] sm:$0xff] }
 0x6fb   :  { %v3306_v1 = vadd.f32 %v3305_v13, %v3304_v59  ;;  %v3316_v41 = vrot.slane %v3315_v20, 1  ;;  %v8548_v59 = vsub.f32 %v3893_v8, %v3917_v42  ;;  %v8553_v13 = vsub.f32 %v3895_v52, %v3923_v37 }
 0x6fd   :  { %v3307_v33 = vmul.f32 0.03125, %v3306_v1  ;;  %v3317_v55 = vadd.f32 %v3316_v41, %v3315_v20  ;;  %v8555_v20 = vsub.f32 %v3896_v58, %v3926_v3  ;;  %v3929_v1 = vand.u32 4294901760, %v3897_v27 }
 0x6fe   :  { %v3932_v41 = vand.u32 4294901760, %v3898_v40 }
 0x6ff   :  { %v3318_v36 = vmul.f32 0.03125, %v3317_v55  ;;  %v3319_v17 = vmul.f32 %v3307_v33, %v3307_v33  ;;  %v4003_v55 = vand.u32 4294901760, %v8538_v2 }
 0x701   :  { %v3320_v14 = vsub.f32 %v3318_v36, %v3319_v17  ;;  %v8560_v36 = vpack.c.bf16 %v3932_v41, %v3929_v1  ;;  %v8562_v17 = vsub.f32 %v3897_v27, %v3929_v1 }
 0x703   :  { %v3321_v60 = vmax.f32 %v3320_v14, 0.0  ;;  %v8564_v14 = vsub.f32 %v3898_v40, %v3932_v41 }
 0x705   :  { %v3322_v21 = vadd.f32 1e-05, %v3321_v60 }
 0x707   :  { %6980 = vrsqrt.f32 %v3322_v21  ;;  %v4004_v21 = vsub.f32 %v8538_v2, %v4003_v55 }
 0x711   :  { %v6981_v45 = vpop.eup %6980 }
 0x712   :  { %v3324_v48 = vsel %vm1966_vm3, %v3307_v33, %v6981_v45  ;;  %v3996_v33 = vand.u32 4294901760, %v8536_v15  ;;  %v4010_v45 = vand.u32 4294901760, %v8548_v59 }
 0x713   :  { %v3327_v22 = vsel %vm3325_vm7, %v3324_v48, 0 }
 0x714   :  { %v3395_v4 = vand.u32 4294901760, %v3327_v22  ;;  %v3997_v60 = vsub.f32 %v8536_v15, %v3996_v33  ;;  %v6643_v54 = vpack.c.bf16 %v4003_v55, %v3996_v33 }
 0x716   :  { %v3396_v62 = vsub.f32 %v3327_v22, %v3395_v4  ;;  %v4005_v22 = vand.u32 4294901760, %v4004_v21 }
 0x718   :  { %v3397_v18 = vand.u32 4294901760, %v3396_v62 }
 0x71a   :  { %v3398_v38 = vsub.f32 %v3396_v62, %v3397_v18 }
 0x71c   :  { %v3399_v12 = vand.u32 4294901760, %v3398_v38  ;;  %v4024_v38 = vand.u32 4294901760, %v8553_v13 }
 0x71e   :  { %6027 = vmatmul.mubr.f32.vlgmr.msra.gmra.mrb[4].mxu0 %v3399_v12 }
 0x71f   :  { %6030 = vmatpush3.msra.mxu0 %v3410_v56  ;;  %6031 = vmatprep.mubr.msk.f32.mxu0 %vm7015_vm5, %v7013_v46  ;;  %v4031_v56 = vand.u32 4294901760, %v8555_v20 }
 0x720   :  { %6034 = vmatprep.subr.mxu0 %v7013_v46 }
 0x726   :  { %6032 = vmatmul.mubr.f32.vlgmr.msra.gmra.mrb[4].mxu0 %v3395_v4 }
 0x727   :  { %6035 = vmatpush3.msra.mxu0 %v3407_v44  ;;  %6036 = vmatprep.mubr.msk.f32.mxu0 %vm7015_vm5, %v7013_v46  ;;  %v3998_v44 = vand.u32 4294901760, %v3997_v60 }
 0x728   :  { %6039 = vmatprep.subr.mxu0 %v7013_v46 }
 0x72e   :  { %6037 = vmatmul.mubr.f32.vlgmr.msra.gmra.mrb[4].mxu0 %v3396_v62  ;;  %v6607_v62 = vpack.c.bf16 %v4005_v22, %v3998_v44 }
 0x72f   :  { %6040 = vmatpush3.msra.mxu0 %v3330_v32  ;;  %6041 = vmatprep.mubr.msk.f32.mxu0 %vm7015_vm5, %v7013_v46 }
 0x730   :  { %6044 = vmatprep.subr.mxu0 %v7013_v46 }
 0x736   :  { %6042 = vmatmul.mubr.f32.vlgmr.msra.gmra.mrb[4].mxu0 %v3397_v18 }
 0x737   :  { %6045 = vmatpush3.msra.mxu0 %v3408_v26  ;;  %6046 = vmatprep.mubr.msk.f32.mxu0 %vm7015_vm5, %v7013_v46  ;;  %v4011_v26 = vsub.f32 %v8548_v59, %v4010_v45 }
 0x738   :  { %6049 = vmatprep.subr.mxu0 %v7013_v46 }
 0x739   :  { %v4012_v31 = vand.u32 4294901760, %v4011_v26 }
 0x73e   :  { %6047 = vmatmul.mubr.f32.vlgmr.msra.gmra.mrb[4].mxu0 %v3395_v4 }
 0x73f   :  { %6050 = vmatpush3.msra.mxu0 %v3330_v32  ;;  %6051 = vmatprep.mubr.msk.f32.mxu0 %vm7015_vm5, %v7013_v46  ;;  %v3920_v32 = vand.u32 4294901760, %v3894_v51 }
 0x740   :  { %6054 = vmatprep.subr.bf16.mxu0 %v7013_v46 }
 0x741   :  { %v8526_v57 = vpack.c.bf16 %v3920_v32, %v3917_v42  ;;  %v8550_v16 = vsub.f32 %v3894_v51, %v3920_v32 }
 0x743   :  { %v4017_v48 = vand.u32 4294901760, %v8550_v16 }
 0x745   :  { %v6646_v10 = vpack.c.bf16 %v4017_v48, %v4010_v45 }
 0x746   :  { %6052 = vmatmul.mubr.f32.vlgmr.msra.gmra.mrb[4].mxu0 %v3395_v4  ;;  %v4018_v4 = vsub.f32 %v8550_v16, %v4017_v48 }
 0x747   :  { %6055 = vmatpush3.bf16.msra.mxu0 %v6962_v49  ;;  %6070 = vmatprep.mubr.msk.bf16.mxu0 %vm7015_vm5, %v7013_v46  ;;  %v4025_v49 = vsub.f32 %v8553_v13, %v4024_v38 }
 0x748   :  { %6056 = vmatprep.subr.bf16.mxu0 %v7013_v46  ;;  %v4019_v18 = vand.u32 4294901760, %v4018_v4 }
 0x74a   :  { %v6610_v12 = vpack.c.bf16 %v4019_v18, %v4012_v31 }
 0x74b   :  { %6057 = vmatpush3.bf16.msra.mxu0 %v6963_v50  ;;  %v4032_v50 = vsub.f32 %v8555_v20, %v4031_v56 }
 0x74c   :  { %6058 = vmatprep.subr.bf16.mxu0 %v7013_v46 }
 0x74f   :  { %6059 = vmatpush3.bf16.msra.mxu0 %v6964_v30  ;;  %v4026_v30 = vand.u32 4294901760, %v4025_v49 }
 0x750   :  { %6060 = vmatprep.subr.bf16.mxu0 %v7013_v46 }
 0x753   :  { %6061 = vmatpush3.bf16.msra.mxu0 %v6965_v6  ;;  %v4033_v6 = vand.u32 4294901760, %v4032_v50 }
 0x754   :  { %6062 = vmatprep.subr.bf16.mxu0 %v7013_v46 }
 0x757   :  { %6063 = vmatpush3.bf16.msra.mxu0 %v6966_v28  ;;  %v4038_v28 = vand.u32 4294901760, %v8562_v17 }
 0x758   :  { %6064 = vmatprep.subr.bf16.mxu0 %v7013_v46 }
 0x75b   :  { %6065 = vmatpush3.bf16.msra.mxu0 %v6967_v43  ;;  %v4045_v43 = vand.u32 4294901760, %v8564_v14 }
 0x75c   :  { %6066 = vmatprep.subr.bf16.mxu0 %v7013_v46 }
 0x75f   :  { %6067 = vmatpush3.bf16.msra.mxu0 %v6968_v53  ;;  %v6613_v53 = vpack.c.bf16 %v4033_v6, %v4026_v30 }
 0x760   :  { %6068 = vmatprep.subr.bf16.mxu0 %v7013_v46 }
 0x763   :  { %6069 = vmatpush3.bf16.msra.mxu0 %v6969_v7  ;;  %v4039_v7 = vsub.f32 %v8562_v17, %v4038_v28 }
 0x764   :  { %6594 = vmatprep.subr.bf16.mxu0 %v7014_v34 }
 0x819   :  { %v3771_v11 = vpop.f32.mrb[4].mxu0 }
 0x81a   :  { %v3778_v0 = vrot.slane %v3771_v11, %v8166_v35  ;;  %v6053_v23 = vpop.f32.mrb[5].mxu0  ;;  %v3783_v24 = vrot.slane %v3771_v11, %v8169_v63  ;;  %v4046_v11 = vsub.f32 %v8564_v14, %v4045_v43 }
 0x81c   :  { %v3779_v29 = vsub.f32 %v8337_v39, %v3778_v0  ;;  %v8516_v39 = vpack.c.bf16 %v3914_v5, %v3911_v19  ;;  %v4040_v0 = vand.u32 4294901760, %v4039_v7  ;;  %v4047_v23 = vand.u32 4294901760, %v4046_v11 }
 0x81d   :  { %v6649_v19 = vpack.c.bf16 %v4031_v56, %v4024_v38  ;;  %v6652_v5 = vpack.c.bf16 %v4045_v43, %v4038_v28 }
 0x81e   :  { %v3784_v25 = vmul.f32 %v3783_v24, %v3779_v29  ;;  %v6616_v29 = vpack.c.bf16 %v4047_v23, %v4040_v0  ;;  %v6619_v24 = vpack.c.bf16 %v8538_v2, %v8536_v15 }
 0x820   :  { %v3785_v61 = vmax.f32 %v3784_v25, 0.0  ;;  %v6622_v25 = vpack.c.bf16 %v8550_v16, %v8548_v59 }
 0x822   :  { %v3786_v47 = vpack.c.bf16 %v3785_v61, %v3785_v61  ;;  %v6625_v61 = vpack.c.bf16 %v8555_v20, %v8553_v13 }
 0x824   :  { %6071 = vmatmul.mubr.bf16.vlgmr.msra.gmra.mrb[8].mxu0 %v3786_v47  ;;  %v6628_v47 = vpack.c.bf16 %v8564_v14, %v8562_v17 }
 0x825   :  { %6090 = vmatprep.mubr.msk.f32.mxu0 %vm7015_vm5, %v7013_v46  ;;  %6596 = vmatpush3.bf16.msra.mxu0 %v8516_v39 }
 0x826   :  { %6597 = vmatprep.subr.bf16.mxu0 %v7014_v34 }
 0x829   :  { %6599 = vmatpush3.bf16.msra.mxu0 %v8526_v57 }
 0x82a   :  { %6600 = vmatprep.subr.bf16.mxu0 %v7014_v34 }
 0x82d   :  { %6602 = vmatpush3.bf16.msra.mxu0 %v8540_v9 }
 0x82e   :  { %6603 = vmatprep.subr.bf16.mxu0 %v7014_v34 }
 0x831   :  { %6605 = vmatpush3.bf16.msra.mxu0 %v8560_v36 }
 0x832   :  { %6606 = vmatprep.subr.bf16.mxu0 %v7014_v34 }
 0x8f7   :  { %v8590_v8 = vpop.f32.mrb[8].mxu0 }
 0x8f8   :  { %v3901_v51 = vmul.f32 %v8590_v8, %v8590_v8  ;;  %v6072_v42 = vpop.f32.mrb[9].mxu0 }
 0x8f9   :  { %v3888_v32 = vpop.f32.mrb[10].mxu0  ;;  %v6972_v42 = vld [vmem:[%s8734_s10 + $0x10] sm:$0xff]  }
 0x8fa   :  { %v3903_v52 = vrot.slane %v3901_v51, 6  ;;  %v6073_v58 = vpop.f32.mrb[11].mxu0  ;;  %v6970_v51 = vld [vmem:[%s8734_s10] sm:$0xff]   ;;  %v6973_v32 = vld [vmem:[%s8734_s10 + $0x18] sm:$0xff]  }
 0x8fc   :  { %v3905_v37 = vsel %vm1076_vm0, %v8590_v8, %v3903_v52 }
 0x8fd   :  { %v3908_v3 = vsel %vm3906_vm8, %v3905_v37, 0 }
 0x8fe   :  { %v3983_v15 = vand.u32 4294901760, %v3908_v3 }
 0x900   :  { %v3984_v2 = vsub.f32 %v3908_v3, %v3983_v15 }
 0x902   :  { %v3985_v27 = vand.u32 4294901760, %v3984_v2 }
 0x904   :  { %v3986_v40 = vsub.f32 %v3984_v2, %v3985_v27 }
 0x906   :  { %v3987_v59 = vand.u32 4294901760, %v3986_v40 }
 0x908   :  { %6091 = vmatmul.mubr.f32.vlgmr.msra.gmra.mrb[6].mxu0 %v3987_v59  ;;  %v6974_v59 = vld [vmem:[%s8735_s11] sm:$0xff]  }
 0x909   :  { %6608 = vmatpush3.bf16.msra.mxu0 %v6607_v62  ;;  %6109 = vmatprep.mubr.msk.f32.mxu0 %vm7015_vm5, %v7013_v46 }
 0x90a   :  { %6609 = vmatprep.subr.bf16.mxu0 %v7014_v34  ;;  %6243 = vmatpush3.bf16.msra.mxu1 %v6974_v59 }
 0x90b   :  { %6244 = vmatprep.subr.bf16.mxu1 %v7013_v46 }
 0x90d   :  { %6611 = vmatpush3.bf16.msra.mxu0 %v6610_v12 }
 0x90e   :  { %6612 = vmatprep.subr.bf16.mxu0 %v7014_v34 }
 0x911   :  { %6614 = vmatpush3.bf16.msra.mxu0 %v6613_v53 }
 0x912   :  { %6615 = vmatprep.subr.bf16.mxu0 %v7014_v34 }
 0x915   :  { %6617 = vmatpush3.bf16.msra.mxu0 %v6616_v29 }
 0x916   :  { %6618 = vmatprep.subr.bf16.mxu0 %v7014_v34 }
 0x918   :  { %6110 = vmatmul.mubr.f32.vlgmr.msra.gmra.mrb[6].mxu0 %v3983_v15 }
 0x919   :  { %6620 = vmatpush3.bf16.msra.mxu0 %v6619_v24  ;;  %6128 = vmatprep.mubr.msk.f32.mxu0 %vm7015_vm5, %v7013_v46 }
 0x91a   :  { %6621 = vmatprep.subr.bf16.mxu0 %v7014_v34 }
 0x91d   :  { %6623 = vmatpush3.bf16.msra.mxu0 %v6622_v25 }
 0x91e   :  { %6624 = vmatprep.subr.bf16.mxu0 %v7014_v34 }
 0x921   :  { %6626 = vmatpush3.bf16.msra.mxu0 %v6625_v61 }
 0x922   :  { %6627 = vmatprep.subr.bf16.mxu0 %v7014_v34 }
 0x925   :  { %6629 = vmatpush3.bf16.msra.mxu0 %v6628_v47 }
 0x926   :  { %6630 = vmatprep.subr.bf16.mxu0 %v7014_v34 }
 0x928   :  { %6129 = vmatmul.mubr.f32.vlgmr.msra.gmra.mrb[6].mxu0 %v3984_v2 }
 0x929   :  { %6632 = vmatpush3.bf16.msra.mxu0 %v8516_v39  ;;  %6147 = vmatprep.mubr.msk.f32.mxu0 %vm7015_vm5, %v7013_v46 }
 0x92a   :  { %6633 = vmatprep.subr.bf16.mxu0 %v7014_v34 }
 0x92d   :  { %6635 = vmatpush3.bf16.msra.mxu0 %v8526_v57 }
 0x92e   :  { %6636 = vmatprep.subr.bf16.mxu0 %v7014_v34 }
 0x931   :  { %6638 = vmatpush3.bf16.msra.mxu0 %v8540_v9 }
 0x932   :  { %6639 = vmatprep.subr.bf16.mxu0 %v7014_v34 }
 0x935   :  { %6641 = vmatpush3.bf16.msra.mxu0 %v8560_v36 }
 0x936   :  { %6642 = vmatprep.subr.bf16.mxu0 %v7014_v34 }
 0x938   :  { %6148 = vmatmul.mubr.f32.vlgmr.msra.gmra.mrb[6].mxu0 %v3985_v27 }
 0x939   :  { %6644 = vmatpush3.bf16.msra.mxu0 %v6643_v54  ;;  %6166 = vmatprep.mubr.msk.f32.mxu0 %vm7015_vm5, %v7013_v46 }
 0x93a   :  { %6645 = vmatprep.subr.bf16.mxu0 %v7014_v34 }
 0x93d   :  { %6647 = vmatpush3.bf16.msra.mxu0 %v6646_v10 }
 0x93e   :  { %6648 = vmatprep.subr.bf16.mxu0 %v7014_v34 }
 0x941   :  { %6650 = vmatpush3.bf16.msra.mxu0 %v6649_v19 }
 0x942   :  { %6651 = vmatprep.subr.bf16.mxu0 %v7014_v34 }
 0x945   :  { %6653 = vmatpush3.bf16.msra.mxu0 %v6652_v5 }
 0x946   :  { %6654 = vmatprep.subr.bf16.mxu0 %v7014_v34 }
 0x948   :  { %6167 = vmatmul.mubr.f32.vlgmr.msra.gmra.mrb[6].mxu0 %v3983_v15 }
 0x949   :  { %6656 = vmatpush3.bf16.msra.mxu0 %v8516_v39  ;;  %6185 = vmatprep.mubr.msk.f32.mxu0 %vm7015_vm5, %v7013_v46  ;;  %v3899_v39 = vld [vmem:[%s8733_s9] sm:$0xff] }
 0x94a   :  { %6657 = vmatprep.subr.bf16.mxu0 %v7014_v34  ;;  %v4478_v16 = vand.u32 4294901760, %v3899_v39 }
 0x94c   :  { %v4556_v20 = vsub.f32 %v3899_v39, %v4478_v16 }
 0x94d   :  { %6659 = vmatpush3.bf16.msra.mxu0 %v8526_v57  ;;  %v3900_v57 = vld [vmem:[%s8733_s9 + $0x8] sm:$0xff] }
 0x94e   :  { %6660 = vmatprep.subr.bf16.mxu0 %v7014_v34  ;;  %v4557_v41 = vand.u32 4294901760, %v4556_v20 }
 0x950   :  { %v4558_v55 = vsub.f32 %v4556_v20, %v4557_v41 }
 0x951   :  { %6662 = vmatpush3.bf16.msra.mxu0 %v8540_v9  ;;  %v4481_v9 = vand.u32 4294901760, %v3900_v57 }
 0x952   :  { %6663 = vmatprep.subr.bf16.mxu0 %v7014_v34  ;;  %v4559_v17 = vand.u32 4294901760, %v4558_v55 }
 0x953   :  { %v8643_v13 = vpack.c.bf16 %v4481_v9, %v4478_v16  ;;  %v4563_v1 = vsub.f32 %v3900_v57, %v4481_v9 }
 0x955   :  { %6665 = vmatpush3.bf16.msra.mxu0 %v8560_v36  ;;  %v4564_v33 = vand.u32 4294901760, %v4563_v1  ;;  %v6673_v21 = vpack.c.bf16 %v4563_v1, %v4556_v20 }
 0x956   :  { %6666 = vmatprep.subr.bf16.mxu0 %v7014_v34 }
 0x957   :  { %v4565_v36 = vsub.f32 %v4563_v1, %v4564_v33  ;;  %v6679_v44 = vpack.c.bf16 %v4564_v33, %v4557_v41 }
 0x958   :  { %6186 = vmatmul.mubr.f32.vlgmr.msra.gmra.mrb[6].mxu0 %v3983_v15 }
 0x959   :  { %6192 = vmatprep.mubr.msk.f32.mxu0 %vm7015_vm5, %v7013_v46  ;;  %6668 = vmatpush3.bf16.msra.mxu0 %v8643_v13  ;;  %v4566_v14 = vand.u32 4294901760, %v4565_v36 }
 0x95a   :  { %6669 = vmatprep.subr.bf16.mxu0 %v7014_v34 }
 0x95b   :  { %v6670_v60 = vpack.c.bf16 %v4566_v14, %v4559_v17 }
 0xa2b   :  { %v4443_v45 = vpop.f32.mrb[6].mxu0 }
 0xa2c   :  { %v4448_v48 = vsel %vm4447_vm9, %v4443_v45, 0.0  ;;  %v4457_v22 = vrot.slane %v4443_v45, 2  ;;  %v6187_v26 = vpop.f32.mrb[7].mxu0 }
 0xa2d   :  { %v4449_v4 = vrot.slane %v4448_v48, 4 }
 0xa2e   :  { %v4459_v62 = vsel %vm4447_vm9, %v4457_v22, 0.0 }
 0xa2f   :  { %v4450_v31 = vadd.f32 %v4449_v4, %v4448_v48  ;;  %v4460_v18 = vrot.slane %v4459_v62, 4 }
 0xa31   :  { %v4451_v38 = vrot.slane %v4450_v31, 2  ;;  %v4461_v56 = vadd.f32 %v4460_v18, %v4459_v62 }
 0xa33   :  { %v4452_v12 = vadd.f32 %v4451_v38, %v4450_v31  ;;  %v4462_v49 = vrot.slane %v4461_v56, 2 }
 0xa35   :  { %v4453_v50 = vrot.slane %v4452_v12, 1  ;;  %v4463_v30 = vadd.f32 %v4462_v49, %v4461_v56  ;;  %v6976_v56 = vld [vmem:[%s8736_s12] sm:$0xff]  }
 0xa37   :  { %v4454_v6 = vadd.f32 %v4453_v50, %v4452_v12  ;;  %v4464_v28 = vrot.slane %v4463_v30, 1  ;;  %v6977_v12 = vld [vmem:[%s8736_s12 + $0x8] sm:$0xff]  }
 0xa39   :  { %v4455_v43 = vmul.f32 0.125, %v4454_v6  ;;  %v4465_v53 = vadd.f32 %v4464_v28, %v4463_v30 }
 0xa3b   :  { %v4466_v7 = vmul.f32 0.125, %v4465_v53  ;;  %v4467_v11 = vmul.f32 %v4455_v43, %v4455_v43 }
 0xa3d   :  { %v4468_v0 = vsub.f32 %v4466_v7, %v4467_v11 }
 0xa3f   :  { %v4469_v23 = vmax.f32 %v4468_v0, 0.0 }
 0xa41   :  { %v4470_v29 = vadd.f32 1e-05, %v4469_v23 }
 0xa43   :  { %6982 = vrsqrt.f32 %v4470_v29 }
 0xa4d   :  { %v6983_v24 = vpop.eup %6982 }
 0xa4e   :  { %v4472_v25 = vsel %vm1966_vm3, %v4455_v43, %v6983_v24 }
 0xa4f   :  { %v4475_v61 = vsel %vm4473_vm10, %v4472_v25, 0 }
 0xa50   :  { %v4544_v47 = vand.u32 4294901760, %v4475_v61 }
 0xa52   :  { %v4545_v54 = vsub.f32 %v4475_v61, %v4544_v47 }
 0xa54   :  { %v4546_v10 = vand.u32 4294901760, %v4545_v54 }
 0xa56   :  { %v4547_v19 = vsub.f32 %v4545_v54, %v4546_v10 }
 0xa58   :  { %v4548_v5 = vand.u32 4294901760, %v4547_v19 }
 0xa5a   :  { %6193 = vmatmul.mubr.f32.vlgmr.msra.gmra.mrb[12].mxu0 %v4548_v5 }
 0xa5b   :  { %6671 = vmatpush3.bf16.msra.mxu0 %v6670_v60  ;;  %6199 = vmatprep.mubr.msk.f32.mxu0 %vm7015_vm5, %v7013_v46 }
 0xa5c   :  { %6672 = vmatprep.subr.bf16.mxu0 %v7014_v34 }
 0xa62   :  { %6200 = vmatmul.mubr.f32.vlgmr.msra.gmra.mrb[12].mxu0 %v4544_v47 }
 0xa63   :  { %6674 = vmatpush3.bf16.msra.mxu0 %v6673_v21  ;;  %6206 = vmatprep.mubr.msk.f32.mxu0 %vm7015_vm5, %v7013_v46 }
 0xa64   :  { %6675 = vmatprep.subr.bf16.mxu0 %v7014_v34 }
 0xa6a   :  { %6207 = vmatmul.mubr.f32.vlgmr.msra.gmra.mrb[12].mxu0 %v4545_v54 }
 0xa6b   :  { %6677 = vmatpush3.bf16.msra.mxu0 %v8643_v13  ;;  %6213 = vmatprep.mubr.msk.f32.mxu0 %vm7015_vm5, %v7013_v46 }
 0xa6c   :  { %6678 = vmatprep.subr.bf16.mxu0 %v7014_v34 }
 0xa72   :  { %6214 = vmatmul.mubr.f32.vlgmr.msra.gmra.mrb[12].mxu0 %v4546_v10 }
 0xa73   :  { %6680 = vmatpush3.bf16.msra.mxu0 %v6679_v44  ;;  %6220 = vmatprep.mubr.msk.f32.mxu0 %vm7015_vm5, %v7013_v46 }
 0xa74   :  { %6681 = vmatprep.subr.bf16.mxu0 %v7014_v34  ;;  %v6971_v34 = vld [vmem:[%s8734_s10 + $0x8] sm:$0xff]  }
 0xa7a   :  { %6221 = vmatmul.mubr.f32.vlgmr.msra.gmra.mrb[12].mxu0 %v4544_v47 }
 0xa7b   :  { %6683 = vmatpush3.bf16.msra.mxu0 %v8643_v13  ;;  %6227 = vmatprep.mubr.msk.f32.mxu0 %vm7015_vm5, %v7013_v46 }
 0xa7c   :  { %6230 = vmatprep.subr.bf16.mxu0 %v7013_v46 }
 0xa82   :  { %6228 = vmatmul.mubr.f32.vlgmr.msra.gmra.mrb[12].mxu0 %v4544_v47 }
 0xa83   :  { %6231 = vmatpush3.bf16.msra.mxu0 %v6970_v51  ;;  %6238 = vmatprep.mubr.msk.bf16.mxu0 %vm7015_vm5, %v7013_v46 }
 0xa84   :  { %6232 = vmatprep.subr.bf16.mxu0 %v7013_v46 }
 0xa87   :  { %6233 = vmatpush3.bf16.msra.mxu0 %v6971_v34 }
 0xa88   :  { %6234 = vmatprep.subr.bf16.mxu0 %v7013_v46 }
 0xa8b   :  { %6235 = vmatpush3.bf16.msra.mxu0 %v6972_v42 }
 0xa8c   :  { %6236 = vmatprep.subr.bf16.mxu0 %v7013_v46 }
 0xa8f   :  { %6237 = vmatpush3.bf16.msra.mxu0 %v6973_v32 }
 0xb55   :  { %v4932_v52 = vpop.f32.mrb[12].mxu0 }
 0xb56   :  { %v4939_v58 = vrot.slane %v4932_v52, %v8166_v35  ;;  %v6229_v37 = vpop.f32.mrb[13].mxu0  ;;  %v4944_v15 = vrot.slane %v4932_v52, %v8169_v63  ;;  %v6975_v35 = vld [vmem:[%s8735_s11 + $0x8] sm:$0xff]  }
 0xb57   :  { %6245 = vmatpush3.bf16.msra.mxu1 %v6975_v35  ;;  %v5372_v37 = vld [vmem:[%s8737_s13] ss:$0 sm:$0xff] }
 0xb58   :  { %v4940_v3 = vsub.f32 %v8590_v8, %v4939_v58  ;;  %6250 = vmatprep.subr.bf16.mxu1 %v7013_v46 }
 0xb5a   :  { %v4945_v2 = vmul.f32 %v4944_v15, %v4940_v3 }
 0xb5c   :  { %v4946_v27 = vmax.f32 %v4945_v2, 0.0 }
 0xb5e   :  { %v4947_v40 = vpack.c.bf16 %v4946_v27, %v4946_v27 }
 0xb60   :  { %6239 = vmatmul.mubr.msk.bf16.vlgmr.msra.gmra.mrb[16].mxu0 %vm3906_vm8, %v4947_v40 }
 0xc33   :  { %v5017_v63 = vpop.f32.mrb[16].mxu0 }
 0xc34   :  { %v5024_v8 = vsel %vm5023_vm11, %v5017_v63, 0.0  ;;  %v6240_v39 = vpop.f32.mrb[17].mxu0 }
 0xc35   :  { %v5025_v57 = vrot.slane %v5024_v8, 4  ;;  %v5020_v16 = vpop.f32.mrb[18].mxu0 }
 0xc36   :  { %v6241_v9 = vpop.f32.mrb[19].mxu0 }
 0xc37   :  { %v5026_v13 = vadd.f32 %v5025_v57, %v5024_v8 }
 0xc39   :  { %v5027_v20 = vrot.slane %v5026_v13, 2 }
 0xc3b   :  { %v5028_v1 = vadd.f32 %v5027_v20, %v5026_v13 }
 0xc3d   :  { %v5029_v41 = vrot.slane %v5028_v1, 1 }
 0xc3f   :  { %v5030_v33 = vadd.f32 %v5029_v41, %v5028_v1 }
 0xc41   :  { %v5032_v55 = vmul.f32 0.5, %v5030_v33 }
 0xc43   :  { %v5033_v36 = vsub.f32 %v5017_v63, %v5032_v55 }
 0xc45   :  { %v5034_v17 = vmul.f32 %v5033_v36, %v5033_v36 }
 0xc47   :  { %v5035_v14 = vsel %vm5023_vm11, %v5034_v17, 0.0 }
 0xc48   :  { %v5036_v60 = vrot.slane %v5035_v14, 4 }
 0xc4a   :  { %v5037_v21 = vadd.f32 %v5036_v60, %v5035_v14 }
 0xc4c   :  { %v5038_v44 = vrot.slane %v5037_v21, 2 }
 0xc4e   :  { %v5039_v45 = vadd.f32 %v5038_v44, %v5037_v21 }
 0xc50   :  { %v5040_v48 = vrot.slane %v5039_v45, 1 }
 0xc52   :  { %v5041_v22 = vadd.f32 %v5040_v48, %v5039_v45 }
 0xc54   :  { %v5042_v26 = vmul.f32 0.5, %v5041_v22 }
 0xc56   :  { %v5043_v4 = vadd.f32 1e-05, %v5042_v26 }
 0xc58   :  { %6984 = vrsqrt.f32 %v5043_v4 }
 0xc62   :  { %v6985_v62 = vpop.eup %6984 }
 0xc63   :  { %v5045_v31 = vmul.f32 %v6985_v62, %v5033_v36 }
 0xc65   :  { %v5046_v18 = vmax.f32 %v5045_v31, 0.0 }
 0xc67   :  { %v5047_v38 = vpack.c.bf16 %v5046_v18, %v5046_v18 }
 0xc69   :  { %6247 = vmatmul.mubr.msk.bf16.vlgmr.msra.gmra.mrb[20].mxu1 %vm5064_vm12, %v5047_v38 }
 0xc6a   :  { %6254 = vmatprep.mubr.msk.bf16.mxu1 %vm7015_vm5, %v7013_v46  ;;  %6251 = vmatpush3.bf16.msra.mxu1 %v6976_v56 }
 0xc6b   :  { %6252 = vmatprep.subr.bf16.mxu1 %v7013_v46 }
 0xc6e   :  { %6253 = vmatpush3.bf16.msra.mxu1 %v6977_v12 }
 0xd3c   :  { %v5102_v49 = vpop.f32.mrb[20].mxu1 }
 0xd3d   :  { %v5108_v50 = vsel %vm5023_vm11, %v5102_v49, 0.0  ;;  %v6248_v30 = vpop.f32.mrb[21].mxu1 }
 0xd3e   :  { %v5109_v6 = vrot.slane %v5108_v50, 4  ;;  %v5105_v28 = vpop.f32.mrb[22].mxu1 }
 0xd3f   :  { %v6249_v43 = vpop.f32.mrb[23].mxu1 }
 0xd40   :  { %v5110_v53 = vadd.f32 %v5109_v6, %v5108_v50 }
 0xd42   :  { %v5111_v7 = vrot.slane %v5110_v53, 2 }
 0xd44   :  { %v5112_v11 = vadd.f32 %v5111_v7, %v5110_v53 }
 0xd46   :  { %v5113_v0 = vrot.slane %v5112_v11, 1 }
 0xd48   :  { %v5114_v23 = vadd.f32 %v5113_v0, %v5112_v11 }
 0xd4a   :  { %v5115_v29 = vmul.f32 0.5, %v5114_v23 }
 0xd4c   :  { %v5116_v24 = vsub.f32 %v5102_v49, %v5115_v29 }
 0xd4e   :  { %v5117_v46 = vmul.f32 %v5116_v24, %v5116_v24 }
 0xd50   :  { %v5118_v25 = vsel %vm5023_vm11, %v5117_v46, 0.0 }
 0xd51   :  { %v5119_v61 = vrot.slane %v5118_v25, 4 }
 0xd53   :  { %v5120_v47 = vadd.f32 %v5119_v61, %v5118_v25 }
 0xd55   :  { %v5121_v54 = vrot.slane %v5120_v47, 2 }
 0xd57   :  { %v5122_v10 = vadd.f32 %v5121_v54, %v5120_v47 }
 0xd59   :  { %v5123_v19 = vrot.slane %v5122_v10, 1 }
 0xd5b   :  { %v5124_v5 = vadd.f32 %v5123_v19, %v5122_v10 }
 0xd5d   :  { %v5125_v51 = vmul.f32 0.5, %v5124_v5 }
 0xd5f   :  { %v5126_v34 = vadd.f32 1e-05, %v5125_v51 }
 0xd61   :  { %6986 = vrsqrt.f32 %v5126_v34 }
 0xd6b   :  { %v6987_v42 = vpop.eup %6986 }
 0xd6c   :  { %v5128_v32 = vmul.f32 %v6987_v42, %v5116_v24 }
 0xd6e   :  { %v5129_v52 = vmax.f32 %v5128_v32, 0.0 }
 0xd70   :  { %v5130_v58 = vpack.c.bf16 %v5129_v52, %v5129_v52 }
 0xd72   :  { %6255 = vmatmul.mubr.msk.bf16.vlgmr.msra.gmra.mrb[24].mxu1 %vm5064_vm12, %v5130_v58 }
 0xe45   :  { %v5191_v3 = vpop.f32.mrb[24].mxu1 }
 0xe46   :  { %v5192_v15 = vadd.f32 %v5372_v37, %v5191_v3  ;;  %v6256_v2 = vpop.f32.mrb[25].mxu1 }
 0xe47   :  { %v5194_v27 = vpop.f32.mrb[26].mxu1 }
 0xe48   :  { %5197 = vst [vmem:[#allocation2] sm:$0x3] %v5192_v15  ;;  %v6257_v40 = vpop.f32.mrb[27].mxu1 }
 0xe49   :  { %6999 = shalt.err (!%p6996_p4)
}
 0xe4a   :  { %s7000_s13 = scalar_lea.hbm %s8738_s14, 32 }
 0xe4b   :  { %p7001_p5 = scmp.ne.s32.totalorder %s8738_s14, %s7000_s13  ;;  %p7004_p6 = scmp.lt.u32.totalorder %s7000_s13, %s8738_s14 }
 0xe4d   :  { %p7006_p7 = pnand %p7004_p6, %p7001_p5 }
 0xe4f   :  { %7009 = shalt.err (!%p7006_p7)
}
 0xe50   :  { %5207 = dma.vmem_to_hbm [thread:$0]  %s5205_s23, 32, %s8738_s14, [#allocation3]  }
 0xe51   :  { %7010 = dma.done.wait [#allocation3], 32  }
 0xe52   :  { %7011 = vsyncadd [#allocation3], 4294967264 }
 0xe53   :  { %5211 = vsyncpa [#allocation3], 1 }

</bundles_post_ra>
